<compile_context>
chip_gen: v7x
topology: tpu7x:2x2x1
jax: 0.10.0
libtpu: 0.0.40
codegen_flags: <defaults>
</compile_context>

<pallas_src>
import functools

import jax
import jax.numpy as jnp
from jax.experimental import pallas as pl
from jax.experimental.pallas import tpu as pltpu

# ---- small CLIP-ViT-style config ----
BATCH = 2
IN_CH = 3
IMG = 16
PATCH = 8
WIDTH = 32          # transformer width
HEADS = 4
HEAD_DIM = WIDTH // HEADS
MLP_DIM = WIDTH * 4
EMBED_DIM = 16      # output embedding dim (proj)
GRID = IMG // PATCH
N_PATCH = GRID * GRID
SEQ = N_PATCH + 1   # + class token
PATCH_DIM = IN_CH * PATCH * PATCH
LN_EPS = 1e-5
LANE = 128

BS = BATCH * SEQ    # batch folded into the sublane axis


def _round_up(n, m):
    return (n + m - 1) // m * m


# ---- matrix slab layout (bf16, 128 lanes; all row offsets multiples of 16) ----
MAT_CONV = 0                          # (PATCH_DIM, WIDTH)
MAT_FCW = MAT_CONV + PATCH_DIM        # (WIDTH, MLP_DIM)
MAT_CPROJ = MAT_FCW + WIDTH           # (MLP_DIM, WIDTH)
MAT_PROJ = MAT_CPROJ + MLP_DIM        # (WIDTH, EMBED_DIM)
MAT_ROWS = MAT_PROJ + WIDTH

# ---- vector slab layout (f32, 128 lanes) ----
VEC_LN_PRE_G, VEC_LN_PRE_B = 0, 1
VEC_LN1_G, VEC_LN1_B = 2, 3
VEC_OUT_B = 4
VEC_LN2_G, VEC_LN2_B = 5, 6
VEC_FC_B = 7
VEC_CPROJ_B = 8
VEC_LNP_G, VEC_LNP_B = 9, 10
VEC_POS = 16                          # rows [VEC_POS, VEC_POS+BS): pos (+cls in row 0/img)
VEC_MASK = VEC_POS + _round_up(BS, 8)  # rows [VEC_MASK, VEC_MASK+BS): additive attn mask
VEC_ROWS = VEC_MASK + _round_up(BS, 8)


# ----------------------------- fused Pallas kernel -----------------------------

def _ln_rows(x, g, b):
    """Row-wise LayerNorm in f32; g/b are (1, N) f32 values."""
    mu = jnp.mean(x, axis=-1, keepdims=True)
    xc = x - mu
    var = jnp.mean(xc * xc, axis=-1, keepdims=True)
    return xc * jax.lax.rsqrt(var + LN_EPS) * g + b


def _clip_encoder_kernel(tok_ref, w_heads_ref, b_qkv_ref, mats_ref, vecs_ref, o_ref):
    f32, bf16 = jnp.float32, jnp.bfloat16
    bs = tok_ref.shape[0]

    def vec(row, width=WIDTH):
        return vecs_ref[row:row + 1, 0:width]            # (1, width) f32

    # conv1 (patch embed) + class token + positional embedding.
    # tok_ref has an all-zero row in each image's CLS slot and the class embedding is
    # pre-folded into row 0 of the per-image positional table, so this is a single
    # matmul + add (no in-kernel concatenate).
    x = jnp.dot(tok_ref[...], mats_ref[MAT_CONV:MAT_CONV + PATCH_DIM, 0:WIDTH],
                preferred_element_type=f32)
    x = x + vecs_ref[VEC_POS:VEC_POS + bs, 0:WIDTH]

    # ln_pre
    x = _ln_rows(x, vec(VEC_LN_PRE_G), vec(VEC_LN_PRE_B))

    # --- residual attention block: x = x + out_proj(attn(ln_1(x))) ---
    h = _ln_rows(x, vec(VEC_LN1_G), vec(VEC_LN1_B))
    h16 = h.astype(bf16)
    mask = vecs_ref[VEC_MASK:VEC_MASK + bs, 0:bs]        # block-diagonal (per image) mask

    acc = jnp.zeros((bs, WIDTH), f32)
    for hh in range(HEADS):                              # unrolled; every slice is static
        # per-head q/k/v via direct small dots (scale folded into Wq / bq at pack time)
        qh = jnp.dot(h16, w_heads_ref[0, hh], preferred_element_type=f32) + b_qkv_ref[0, hh]
        kh = jnp.dot(h16, w_heads_ref[1, hh], preferred_element_type=f32) + b_qkv_ref[1, hh]
        vh = jnp.dot(h16, w_heads_ref[2, hh], preferred_element_type=f32) + b_qkv_ref[2, hh]

        s = jax.lax.dot_general(qh, kh, (((1,), (1,)), ((), ())),
                                preferred_element_type=f32) + mask      # (bs, bs)
        s = s - jnp.max(s, axis=-1, keepdims=True)
        p = jnp.exp(s)
        p = p / jnp.sum(p, axis=-1, keepdims=True)       # exact divide (tight tolerance)
        oh = jnp.dot(p, vh, preferred_element_type=f32)  # (bs, HEAD_DIM)

        # per-head out-proj accumulation; w_heads[3, hh] holds Wo_h^T (WIDTH, HEAD_DIM)
        acc = acc + jax.lax.dot_general(oh.astype(bf16), w_heads_ref[3, hh],
                                        (((1,), (1,)), ((), ())),
                                        preferred_element_type=f32)
    x = x + acc + vec(VEC_OUT_B)

    # --- MLP block: x = x + c_proj(quick_gelu(c_fc(ln_2(x)))) ---
    h = _ln_rows(x, vec(VEC_LN2_G), vec(VEC_LN2_B))
    h = jnp.dot(h.astype(bf16), mats_ref[MAT_FCW:MAT_FCW + WIDTH, 0:MLP_DIM],
                preferred_element_type=f32) + vec(VEC_FC_B, MLP_DIM)
    h = h * jax.nn.sigmoid(1.702 * h)                    # CLIP QuickGELU
    h = jnp.dot(h.astype(bf16), mats_ref[MAT_CPROJ:MAT_CPROJ + MLP_DIM, 0:WIDTH],
                preferred_element_type=f32) + vec(VEC_CPROJ_B)
    x = x + h

    # ln_post + projection on every token (CLS rows are selected wrapper-side)
    xp = _ln_rows(x, vec(VEC_LNP_G), vec(VEC_LNP_B))
    out = jnp.dot(xp.astype(bf16), mats_ref[MAT_PROJ:MAT_PROJ + WIDTH, 0:EMBED_DIM],
                  preferred_element_type=f32)
    o_ref[...] = out.astype(o_ref.dtype)


# ----------------------------- parameters -----------------------------

def init_params(key):
    ks = jax.random.split(key, 8)
    s = 0.02
    ws = WIDTH ** -0.5
    f32 = jnp.float32
    return {
        # conv1: Conv2d(3, WIDTH, kernel=PATCH, stride=PATCH, bias=False)
        "conv_w": jax.random.normal(ks[0], (WIDTH, IN_CH, PATCH, PATCH), f32) * s,
        "class_emb": jax.random.normal(ks[1], (WIDTH,), f32) * ws,
        "pos_emb": jax.random.normal(ks[2], (SEQ, WIDTH), f32) * ws,
        "ln_pre_g": jnp.ones((1, WIDTH), f32), "ln_pre_b": jnp.zeros((1, WIDTH), f32),
        # residual attention block
        # TODO(synk): synthetic orientation only — real PyTorch CLIP stores
        # in_proj_weight/out_proj/c_fc/c_proj/proj as (out, in); transpose when loading.
        "ln_1_g": jnp.ones((1, WIDTH), f32), "ln_1_b": jnp.zeros((1, WIDTH), f32),
        "in_proj_w": jax.random.normal(ks[3], (WIDTH, 3 * WIDTH), f32) * s,  # applied x @ W
        "in_proj_b": jnp.zeros((1, 3 * WIDTH), f32),
        "out_proj_w": jax.random.normal(ks[4], (WIDTH, WIDTH), f32) * s,
        "out_proj_b": jnp.zeros((1, WIDTH), f32),
        "ln_2_g": jnp.ones((1, WIDTH), f32), "ln_2_b": jnp.zeros((1, WIDTH), f32),
        "c_fc_w": jax.random.normal(ks[5], (WIDTH, MLP_DIM), f32) * s,
        "c_fc_b": jnp.zeros((1, MLP_DIM), f32),
        "c_proj_w": jax.random.normal(ks[6], (MLP_DIM, WIDTH), f32) * s,
        "c_proj_b": jnp.zeros((1, WIDTH), f32),
        "ln_post_g": jnp.ones((1, WIDTH), f32), "ln_post_b": jnp.zeros((1, WIDTH), f32),
        "proj": jax.random.normal(ks[7], (WIDTH, EMBED_DIM), f32) * ws,
    }


def pack_params(p, batch):
    """One-time parameter transform into the few packed slabs the kernel consumes."""
    f32, bf16 = jnp.float32, jnp.bfloat16
    scale = HEAD_DIM ** -0.5
    bs = batch * SEQ

    # per-head q/k/v weights (scale folded into Wq) + per-head out-proj transposed
    w_in = p["in_proj_w"]                                   # (WIDTH, 3*WIDTH)
    b_in = p["in_proj_b"].reshape(3 * WIDTH)

    def heads_in(w):   # (WIDTH, WIDTH) -> (HEADS, WIDTH, HEAD_DIM)
        return w.reshape(WIDTH, HEADS, HEAD_DIM).transpose(1, 0, 2)

    wq = heads_in(w_in[:, 0:WIDTH] * scale)
    wk = heads_in(w_in[:, WIDTH:2 * WIDTH])
    wv = heads_in(w_in[:, 2 * WIDTH:3 * WIDTH])
    wo_t = p["out_proj_w"].reshape(HEADS, HEAD_DIM, WIDTH).transpose(0, 2, 1)
    w_heads = jnp.stack([wq, wk, wv, wo_t]).astype(bf16)    # (4, HEADS, WIDTH, HEAD_DIM)

    def heads_b(b):    # (WIDTH,) -> (HEADS, 1, HEAD_DIM)
        return b.reshape(HEADS, 1, HEAD_DIM)

    b_qkv = jnp.stack([heads_b(b_in[0:WIDTH] * scale),
                       heads_b(b_in[WIDTH:2 * WIDTH]),
                       heads_b(b_in[2 * WIDTH:3 * WIDTH])]).astype(f32)  # (3, H, 1, HD)

    # matrix slab (bf16, 128 lanes, 16-row-aligned regions)
    mats = jnp.zeros((MAT_ROWS, LANE), f32)
    conv_w = p["conv_w"].reshape(WIDTH, PATCH_DIM).T        # (PATCH_DIM, WIDTH)
    mats = mats.at[MAT_CONV:MAT_CONV + PATCH_DIM, 0:WIDTH].set(conv_w)
    mats = mats.at[MAT_FCW:MAT_FCW + WIDTH, 0:MLP_DIM].set(p["c_fc_w"])
    mats = mats.at[MAT_CPROJ:MAT_CPROJ + MLP_DIM, 0:WIDTH].set(p["c_proj_w"])
    mats = mats.at[MAT_PROJ:MAT_PROJ + WIDTH, 0:EMBED_DIM].set(p["proj"])
    mats = mats.astype(bf16)

    # vector/table slab (f32, 128 lanes)
    vecs = jnp.zeros((VEC_ROWS, LANE), f32)
    for row, v in [
            (VEC_LN_PRE_G, p["ln_pre_g"]), (VEC_LN_PRE_B, p["ln_pre_b"]),
            (VEC_LN1_G, p["ln_1_g"]), (VEC_LN1_B, p["ln_1_b"]),
            (VEC_OUT_B, p["out_proj_b"]),
            (VEC_LN2_G, p["ln_2_g"]), (VEC_LN2_B, p["ln_2_b"]),
            (VEC_FC_B, p["c_fc_b"]), (VEC_CPROJ_B, p["c_proj_b"]),
            (VEC_LNP_G, p["ln_post_g"]), (VEC_LNP_B, p["ln_post_b"])]:
        v = v.reshape(-1)
        vecs = vecs.at[row, 0:v.shape[0]].set(v)

    # positional table with class embedding folded into row 0, tiled per image
    pos_pc = p["pos_emb"].at[0].add(p["class_emb"])         # (SEQ, WIDTH)
    vecs = vecs.at[VEC_POS:VEC_POS + bs, 0:WIDTH].set(jnp.tile(pos_pc, (batch, 1)))

    # block-diagonal (per-image) additive attention mask
    img = jnp.arange(bs) // SEQ
    mask = jnp.where(img[:, None] == img[None, :], 0.0, -1e30).astype(f32)
    vecs = vecs.at[VEC_MASK:VEC_MASK + bs, 0:bs].set(mask)

    return {"w_heads": w_heads, "b_qkv": b_qkv, "mats": mats, "vecs": vecs}


# ----------------------------- encode_image -----------------------------

def encode_image(image, packed):
    B = image.shape[0]
    assert B * SEQ == BS, "packed params were built for a different batch size"
    bs = B * SEQ

    # Non-overlapping patch extraction (pure layout glue; stays in XLA), with one zero
    # row per image in the CLS slot so the conv matmul yields a zero row there.
    patches = image.reshape(B, IN_CH, GRID, PATCH, GRID, PATCH)
    patches = patches.transpose(0, 2, 4, 1, 3, 5).reshape(B, N_PATCH, PATCH_DIM)
    tokens = jnp.pad(patches, ((0, 0), (1, 0), (0, 0)))
    tokens = tokens.reshape(bs, PATCH_DIM).astype(jnp.bfloat16)

    out = pl.pallas_call(
        _clip_encoder_kernel,
        out_shape=jax.ShapeDtypeStruct((bs, EMBED_DIM), jnp.float32),
        grid=(1,),
        in_specs=[
            pl.BlockSpec((bs, PATCH_DIM), lambda i: (0, 0)),                 # tokens
            pl.BlockSpec((4, HEADS, WIDTH, HEAD_DIM), lambda i: (0, 0, 0, 0)),  # per-head W
            pl.BlockSpec((3, HEADS, 1, HEAD_DIM), lambda i: (0, 0, 0, 0)),      # qkv biases
            pl.BlockSpec((MAT_ROWS, LANE), lambda i: (0, 0)),                # matrix slab
            pl.BlockSpec((VEC_ROWS, LANE), lambda i: (0, 0)),                # vector slab
        ],
        out_specs=pl.BlockSpec((bs, EMBED_DIM), lambda i: (0, 0)),
        compiler_params=pltpu.CompilerParams(
            dimension_semantics=("arbitrary",)),   # batch folded; no per-core split at B=2
    )(tokens, packed["w_heads"], packed["b_qkv"], packed["mats"], packed["vecs"])

    # CLS-row selection (row 0 of each image) is wrapper-side layout glue.
    return out.reshape(B, SEQ, EMBED_DIM)[:, 0, :]


if __name__ == "__main__":
    key = jax.random.PRNGKey(0)
    pkey, xkey = jax.random.split(key)
    params = init_params(pkey)
    packed = pack_params(params, BATCH)
    image = jax.random.normal(xkey, (BATCH, IN_CH, IMG, IMG), jnp.float32)  # NCHW like PyTorch

    out = jax.jit(encode_image)(image, packed)
    jax.block_until_ready(out)
    assert out.shape == (BATCH, EMBED_DIM) and out.dtype == jnp.float32
    print("KERNEL_OK")
</pallas_src>

<mosaic_0001>
module attributes {stable_mosaic.version = 11 : i64} {
  func.func @_clip_encoder_kernel(%arg0: i32, %arg1: memref<10x192xbf16, #tpu.memory_space<vmem>>, %arg2: memref<4x4x32x8xbf16, #tpu.memory_space<vmem>>, %arg3: memref<3x4x1x8xf32, #tpu.memory_space<vmem>>, %arg4: memref<384x128xbf16, #tpu.memory_space<vmem>>, %arg5: memref<48x128xf32, #tpu.memory_space<vmem>>, %arg6: memref<10x16xf32, #tpu.memory_space<vmem>>) attributes {dimension_semantics = [#tpu.dimension_semantics<arbitrary>], iteration_bounds = array<i64: 1>, scalar_prefetch = 0 : i64, scratch_operands = 0 : i64, tpu.core_type = #tpu.core_type<tc>, window_params = [{pipeline_mode = #tpu.pipeline_mode<synchronous>, transform_indices = @transform_0, window_bounds = array<i64: 10, 192>}, {pipeline_mode = #tpu.pipeline_mode<synchronous>, transform_indices = @transform_1, window_bounds = array<i64: 4, 4, 32, 8>}, {pipeline_mode = #tpu.pipeline_mode<synchronous>, transform_indices = @transform_2, window_bounds = array<i64: 3, 4, 1, 8>}, {pipeline_mode = #tpu.pipeline_mode<synchronous>, transform_indices = @transform_3, window_bounds = array<i64: 384, 128>}, {pipeline_mode = #tpu.pipeline_mode<synchronous>, transform_indices = @transform_4, window_bounds = array<i64: 48, 128>}, {pipeline_mode = #tpu.pipeline_mode<synchronous>, transform_indices = @transform_5, window_bounds = array<i64: 10, 16>}]} {
    %c0 = arith.constant 0 : index
    %c0_0 = arith.constant 0 : index
    %0 = vector.load %arg1[%c0, %c0_0] : memref<10x192xbf16, #tpu.memory_space<vmem>>, vector<10x192xbf16>
    %c0_1 = arith.constant 0 : index
    %c0_2 = arith.constant 0 : index
    %1 = vector.load %arg4[%c0_1, %c0_2] : memref<384x128xbf16, #tpu.memory_space<vmem>>, vector<192x32xbf16>
    %cst = arith.constant dense<0.000000e+00> : vector<10x32xf32>
    %2 = tpu.matmul %0, %1, %cst {dimension_numbers = #tpu.dot_dimension_numbers<[1], [0], [0], [1], [0, 0, 1, 1], [], []>} : vector<10x192xbf16>, vector<192x32xbf16>, vector<10x32xf32> -> vector<10x32xf32>
    %c16 = arith.constant 16 : index
    %c0_3 = arith.constant 0 : index
    %3 = vector.load %arg5[%c16, %c0_3] : memref<48x128xf32, #tpu.memory_space<vmem>>, vector<10x32xf32>
    %4 = arith.addf %2, %3 : vector<10x32xf32>
    %c0_4 = arith.constant 0 : index
    %c0_5 = arith.constant 0 : index
    %5 = vector.load %arg5[%c0_4, %c0_5] : memref<48x128xf32, #tpu.memory_space<vmem>>, vector<1x32xf32>
    %c1 = arith.constant 1 : index
    %c0_6 = arith.constant 0 : index
    %6 = vector.load %arg5[%c1, %c0_6] : memref<48x128xf32, #tpu.memory_space<vmem>>, vector<1x32xf32>
    %cst_7 = arith.constant dense<0.000000e+00> : vector<10xf32>
    %7 = vector.multi_reduction <add>, %4, %cst_7 [1] : vector<10x32xf32> to vector<10xf32>
    %8 = vector.shape_cast %7 : vector<10xf32> to vector<10x1xf32>
    %cst_8 = arith.constant 3.200000e+01 : f32
    %9 = vector.broadcast %cst_8 : f32 to vector<10x1xf32>
    %10 = arith.divf %8, %9 : vector<10x1xf32>
    %11 = vector.broadcast %10 : vector<10x1xf32> to vector<10x32xf32>
    %12 = arith.subf %4, %11 : vector<10x32xf32>
    %13 = arith.mulf %12, %12 : vector<10x32xf32>
    %cst_9 = arith.constant dense<0.000000e+00> : vector<10xf32>
    %14 = vector.multi_reduction <add>, %13, %cst_9 [1] : vector<10x32xf32> to vector<10xf32>
    %15 = vector.shape_cast %14 : vector<10xf32> to vector<10x1xf32>
    %cst_10 = arith.constant 3.200000e+01 : f32
    %16 = vector.broadcast %cst_10 : f32 to vector<10x1xf32>
    %17 = arith.divf %15, %16 : vector<10x1xf32>
    %cst_11 = arith.constant 9.99999974E-6 : f32
    %18 = vector.broadcast %cst_11 : f32 to vector<10x1xf32>
    %19 = arith.addf %17, %18 : vector<10x1xf32>
    %20 = math.rsqrt %19 : vector<10x1xf32>
    %21 = vector.broadcast %20 : vector<10x1xf32> to vector<10x32xf32>
    %22 = arith.mulf %12, %21 : vector<10x32xf32>
    %23 = vector.broadcast %5 : vector<1x32xf32> to vector<10x32xf32>
    %24 = arith.mulf %22, %23 : vector<10x32xf32>
    %25 = vector.broadcast %6 : vector<1x32xf32> to vector<10x32xf32>
    %26 = arith.addf %24, %25 : vector<10x32xf32>
    %c2 = arith.constant 2 : index
    %c0_12 = arith.constant 0 : index
    %27 = vector.load %arg5[%c2, %c0_12] : memref<48x128xf32, #tpu.memory_space<vmem>>, vector<1x32xf32>
    %c3 = arith.constant 3 : index
    %c0_13 = arith.constant 0 : index
    %28 = vector.load %arg5[%c3, %c0_13] : memref<48x128xf32, #tpu.memory_space<vmem>>, vector<1x32xf32>
    %cst_14 = arith.constant dense<0.000000e+00> : vector<10xf32>
    %29 = vector.multi_reduction <add>, %26, %cst_14 [1] : vector<10x32xf32> to vector<10xf32>
    %30 = vector.shape_cast %29 : vector<10xf32> to vector<10x1xf32>
    %cst_15 = arith.constant 3.200000e+01 : f32
    %31 = vector.broadcast %cst_15 : f32 to vector<10x1xf32>
    %32 = arith.divf %30, %31 : vector<10x1xf32>
    %33 = vector.broadcast %32 : vector<10x1xf32> to vector<10x32xf32>
    %34 = arith.subf %26, %33 : vector<10x32xf32>
    %35 = arith.mulf %34, %34 : vector<10x32xf32>
    %cst_16 = arith.constant dense<0.000000e+00> : vector<10xf32>
    %36 = vector.multi_reduction <add>, %35, %cst_16 [1] : vector<10x32xf32> to vector<10xf32>
    %37 = vector.shape_cast %36 : vector<10xf32> to vector<10x1xf32>
    %cst_17 = arith.constant 3.200000e+01 : f32
    %38 = vector.broadcast %cst_17 : f32 to vector<10x1xf32>
    %39 = arith.divf %37, %38 : vector<10x1xf32>
    %cst_18 = arith.constant 9.99999974E-6 : f32
    %40 = vector.broadcast %cst_18 : f32 to vector<10x1xf32>
    %41 = arith.addf %39, %40 : vector<10x1xf32>
    %42 = math.rsqrt %41 : vector<10x1xf32>
    %43 = vector.broadcast %42 : vector<10x1xf32> to vector<10x32xf32>
    %44 = arith.mulf %34, %43 : vector<10x32xf32>
    %45 = vector.broadcast %27 : vector<1x32xf32> to vector<10x32xf32>
    %46 = arith.mulf %44, %45 : vector<10x32xf32>
    %47 = vector.broadcast %28 : vector<1x32xf32> to vector<10x32xf32>
    %48 = arith.addf %46, %47 : vector<10x32xf32>
    %49 = arith.truncf %48 : vector<10x32xf32> to vector<10x32xbf16>
    %c32 = arith.constant 32 : index
    %c0_19 = arith.constant 0 : index
    %50 = vector.load %arg5[%c32, %c0_19] : memref<48x128xf32, #tpu.memory_space<vmem>>, vector<10x10xf32>
    %cst_20 = arith.constant 0.000000e+00 : f32
    %51 = vector.broadcast %cst_20 : f32 to vector<10x32xf32>
    %c0_21 = arith.constant 0 : index
    %c0_22 = arith.constant 0 : index
    %c0_23 = arith.constant 0 : index
    %c0_24 = arith.constant 0 : index
    %52 = vector.load %arg2[%c0_21, %c0_22, %c0_23, %c0_24] : memref<4x4x32x8xbf16, #tpu.memory_space<vmem>>, vector<1x1x32x8xbf16>
    %53 = vector.shape_cast %52 : vector<1x1x32x8xbf16> to vector<32x8xbf16>
    %cst_25 = arith.constant dense<0.000000e+00> : vector<10x8xf32>
    %54 = tpu.matmul %49, %53, %cst_25 {dimension_numbers = #tpu.dot_dimension_numbers<[1], [0], [0], [1], [0, 0, 1, 1], [], []>} : vector<10x32xbf16>, vector<32x8xbf16>, vector<10x8xf32> -> vector<10x8xf32>
    %c0_26 = arith.constant 0 : index
    %c0_27 = arith.constant 0 : index
    %c0_28 = arith.constant 0 : index
    %c0_29 = arith.constant 0 : index
    %55 = vector.load %arg3[%c0_26, %c0_27, %c0_28, %c0_29] : memref<3x4x1x8xf32, #tpu.memory_space<vmem>>, vector<1x1x1x8xf32>
    %56 = vector.shape_cast %55 : vector<1x1x1x8xf32> to vector<1x8xf32>
    %57 = vector.broadcast %56 : vector<1x8xf32> to vector<10x8xf32>
    %58 = arith.addf %54, %57 : vector<10x8xf32>
    %c1_30 = arith.constant 1 : index
    %c0_31 = arith.constant 0 : index
    %c0_32 = arith.constant 0 : index
    %c0_33 = arith.constant 0 : index
    %59 = vector.load %arg2[%c1_30, %c0_31, %c0_32, %c0_33] : memref<4x4x32x8xbf16, #tpu.memory_space<vmem>>, vector<1x1x32x8xbf16>
    %60 = vector.shape_cast %59 : vector<1x1x32x8xbf16> to vector<32x8xbf16>
    %cst_34 = arith.constant dense<0.000000e+00> : vector<10x8xf32>
    %61 = tpu.matmul %49, %60, %cst_34 {dimension_numbers = #tpu.dot_dimension_numbers<[1], [0], [0], [1], [0, 0, 1, 1], [], []>} : vector<10x32xbf16>, vector<32x8xbf16>, vector<10x8xf32> -> vector<10x8xf32>
    %c1_35 = arith.constant 1 : index
    %c0_36 = arith.constant 0 : index
    %c0_37 = arith.constant 0 : index
    %c0_38 = arith.constant 0 : index
    %62 = vector.load %arg3[%c1_35, %c0_36, %c0_37, %c0_38] : memref<3x4x1x8xf32, #tpu.memory_space<vmem>>, vector<1x1x1x8xf32>
    %63 = vector.shape_cast %62 : vector<1x1x1x8xf32> to vector<1x8xf32>
    %64 = vector.broadcast %63 : vector<1x8xf32> to vector<10x8xf32>
    %65 = arith.addf %61, %64 : vector<10x8xf32>
    %c2_39 = arith.constant 2 : index
    %c0_40 = arith.constant 0 : index
    %c0_41 = arith.constant 0 : index
    %c0_42 = arith.constant 0 : index
    %66 = vector.load %arg2[%c2_39, %c0_40, %c0_41, %c0_42] : memref<4x4x32x8xbf16, #tpu.memory_space<vmem>>, vector<1x1x32x8xbf16>
    %67 = vector.shape_cast %66 : vector<1x1x32x8xbf16> to vector<32x8xbf16>
    %cst_43 = arith.constant dense<0.000000e+00> : vector<10x8xf32>
    %68 = tpu.matmul %49, %67, %cst_43 {dimension_numbers = #tpu.dot_dimension_numbers<[1], [0], [0], [1], [0, 0, 1, 1], [], []>} : vector<10x32xbf16>, vector<32x8xbf16>, vector<10x8xf32> -> vector<10x8xf32>
    %c2_44 = arith.constant 2 : index
    %c0_45 = arith.constant 0 : index
    %c0_46 = arith.constant 0 : index
    %c0_47 = arith.constant 0 : index
    %69 = vector.load %arg3[%c2_44, %c0_45, %c0_46, %c0_47] : memref<3x4x1x8xf32, #tpu.memory_space<vmem>>, vector<1x1x1x8xf32>
    %70 = vector.shape_cast %69 : vector<1x1x1x8xf32> to vector<1x8xf32>
    %71 = vector.broadcast %70 : vector<1x8xf32> to vector<10x8xf32>
    %72 = arith.addf %68, %71 : vector<10x8xf32>
    %cst_48 = arith.constant dense<0.000000e+00> : vector<10x10xf32>
    %73 = tpu.matmul %58, %65, %cst_48 {dimension_numbers = #tpu.dot_dimension_numbers<[1], [1], [0], [0], [0, 0, 1, 0], [], []>} : vector<10x8xf32>, vector<10x8xf32>, vector<10x10xf32> -> vector<10x10xf32>
    %74 = arith.addf %73, %50 : vector<10x10xf32>
    %cst_49 = arith.constant dense<0xFF800000> : vector<10xf32>
    %75 = vector.multi_reduction <maximumf>, %74, %cst_49 [1] : vector<10x10xf32> to vector<10xf32>
    %76 = vector.shape_cast %75 : vector<10xf32> to vector<10x1xf32>
    %77 = vector.broadcast %76 : vector<10x1xf32> to vector<10x10xf32>
    %78 = arith.subf %74, %77 : vector<10x10xf32>
    %79 = math.exp %78 : vector<10x10xf32>
    %cst_50 = arith.constant dense<0.000000e+00> : vector<10xf32>
    %80 = vector.multi_reduction <add>, %79, %cst_50 [1] : vector<10x10xf32> to vector<10xf32>
    %81 = vector.shape_cast %80 : vector<10xf32> to vector<10x1xf32>
    %82 = vector.broadcast %81 : vector<10x1xf32> to vector<10x10xf32>
    %83 = arith.divf %79, %82 : vector<10x10xf32>
    %cst_51 = arith.constant dense<0.000000e+00> : vector<10x8xf32>
    %84 = tpu.matmul %83, %72, %cst_51 {dimension_numbers = #tpu.dot_dimension_numbers<[1], [0], [0], [1], [0, 0, 1, 1], [], []>} : vector<10x10xf32>, vector<10x8xf32>, vector<10x8xf32> -> vector<10x8xf32>
    %85 = arith.truncf %84 : vector<10x8xf32> to vector<10x8xbf16>
    %c3_52 = arith.constant 3 : index
    %c0_53 = arith.constant 0 : index
    %c0_54 = arith.constant 0 : index
    %c0_55 = arith.constant 0 : index
    %86 = vector.load %arg2[%c3_52, %c0_53, %c0_54, %c0_55] : memref<4x4x32x8xbf16, #tpu.memory_space<vmem>>, vector<1x1x32x8xbf16>
    %87 = vector.shape_cast %86 : vector<1x1x32x8xbf16> to vector<32x8xbf16>
    %cst_56 = arith.constant dense<0.000000e+00> : vector<10x32xf32>
    %88 = tpu.matmul %85, %87, %cst_56 {dimension_numbers = #tpu.dot_dimension_numbers<[1], [1], [0], [0], [0, 0, 1, 0], [], []>} : vector<10x8xbf16>, vector<32x8xbf16>, vector<10x32xf32> -> vector<10x32xf32>
    %89 = arith.addf %51, %88 : vector<10x32xf32>
    %c0_57 = arith.constant 0 : index
    %c1_58 = arith.constant 1 : index
    %c0_59 = arith.constant 0 : index
    %c0_60 = arith.constant 0 : index
    %90 = vector.load %arg2[%c0_57, %c1_58, %c0_59, %c0_60] : memref<4x4x32x8xbf16, #tpu.memory_space<vmem>>, vector<1x1x32x8xbf16>
    %91 = vector.shape_cast %90 : vector<1x1x32x8xbf16> to vector<32x8xbf16>
    %cst_61 = arith.constant dense<0.000000e+00> : vector<10x8xf32>
    %92 = tpu.matmul %49, %91, %cst_61 {dimension_numbers = #tpu.dot_dimension_numbers<[1], [0], [0], [1], [0, 0, 1, 1], [], []>} : vector<10x32xbf16>, vector<32x8xbf16>, vector<10x8xf32> -> vector<10x8xf32>
    %c0_62 = arith.constant 0 : index
    %c1_63 = arith.constant 1 : index
    %c0_64 = arith.constant 0 : index
    %c0_65 = arith.constant 0 : index
    %93 = vector.load %arg3[%c0_62, %c1_63, %c0_64, %c0_65] : memref<3x4x1x8xf32, #tpu.memory_space<vmem>>, vector<1x1x1x8xf32>
    %94 = vector.shape_cast %93 : vector<1x1x1x8xf32> to vector<1x8xf32>
    %95 = vector.broadcast %94 : vector<1x8xf32> to vector<10x8xf32>
    %96 = arith.addf %92, %95 : vector<10x8xf32>
    %c1_66 = arith.constant 1 : index
    %c1_67 = arith.constant 1 : index
    %c0_68 = arith.constant 0 : index
    %c0_69 = arith.constant 0 : index
    %97 = vector.load %arg2[%c1_66, %c1_67, %c0_68, %c0_69] : memref<4x4x32x8xbf16, #tpu.memory_space<vmem>>, vector<1x1x32x8xbf16>
    %98 = vector.shape_cast %97 : vector<1x1x32x8xbf16> to vector<32x8xbf16>
    %cst_70 = arith.constant dense<0.000000e+00> : vector<10x8xf32>
    %99 = tpu.matmul %49, %98, %cst_70 {dimension_numbers = #tpu.dot_dimension_numbers<[1], [0], [0], [1], [0, 0, 1, 1], [], []>} : vector<10x32xbf16>, vector<32x8xbf16>, vector<10x8xf32> -> vector<10x8xf32>
    %c1_71 = arith.constant 1 : index
    %c1_72 = arith.constant 1 : index
    %c0_73 = arith.constant 0 : index
    %c0_74 = arith.constant 0 : index
    %100 = vector.load %arg3[%c1_71, %c1_72, %c0_73, %c0_74] : memref<3x4x1x8xf32, #tpu.memory_space<vmem>>, vector<1x1x1x8xf32>
    %101 = vector.shape_cast %100 : vector<1x1x1x8xf32> to vector<1x8xf32>
    %102 = vector.broadcast %101 : vector<1x8xf32> to vector<10x8xf32>
    %103 = arith.addf %99, %102 : vector<10x8xf32>
    %c2_75 = arith.constant 2 : index
    %c1_76 = arith.constant 1 : index
    %c0_77 = arith.constant 0 : index
    %c0_78 = arith.constant 0 : index
    %104 = vector.load %arg2[%c2_75, %c1_76, %c0_77, %c0_78] : memref<4x4x32x8xbf16, #tpu.memory_space<vmem>>, vector<1x1x32x8xbf16>
    %105 = vector.shape_cast %104 : vector<1x1x32x8xbf16> to vector<32x8xbf16>
    %cst_79 = arith.constant dense<0.000000e+00> : vector<10x8xf32>
    %106 = tpu.matmul %49, %105, %cst_79 {dimension_numbers = #tpu.dot_dimension_numbers<[1], [0], [0], [1], [0, 0, 1, 1], [], []>} : vector<10x32xbf16>, vector<32x8xbf16>, vector<10x8xf32> -> vector<10x8xf32>
    %c2_80 = arith.constant 2 : index
    %c1_81 = arith.constant 1 : index
    %c0_82 = arith.constant 0 : index
    %c0_83 = arith.constant 0 : index
    %107 = vector.load %arg3[%c2_80, %c1_81, %c0_82, %c0_83] : memref<3x4x1x8xf32, #tpu.memory_space<vmem>>, vector<1x1x1x8xf32>
    %108 = vector.shape_cast %107 : vector<1x1x1x8xf32> to vector<1x8xf32>
    %109 = vector.broadcast %108 : vector<1x8xf32> to vector<10x8xf32>
    %110 = arith.addf %106, %109 : vector<10x8xf32>
    %cst_84 = arith.constant dense<0.000000e+00> : vector<10x10xf32>
    %111 = tpu.matmul %96, %103, %cst_84 {dimension_numbers = #tpu.dot_dimension_numbers<[1], [1], [0], [0], [0, 0, 1, 0], [], []>} : vector<10x8xf32>, vector<10x8xf32>, vector<10x10xf32> -> vector<10x10xf32>
    %112 = arith.addf %111, %50 : vector<10x10xf32>
    %cst_85 = arith.constant dense<0xFF800000> : vector<10xf32>
    %113 = vector.multi_reduction <maximumf>, %112, %cst_85 [1] : vector<10x10xf32> to vector<10xf32>
    %114 = vector.shape_cast %113 : vector<10xf32> to vector<10x1xf32>
    %115 = vector.broadcast %114 : vector<10x1xf32> to vector<10x10xf32>
    %116 = arith.subf %112, %115 : vector<10x10xf32>
    %117 = math.exp %116 : vector<10x10xf32>
    %cst_86 = arith.constant dense<0.000000e+00> : vector<10xf32>
    %118 = vector.multi_reduction <add>, %117, %cst_86 [1] : vector<10x10xf32> to vector<10xf32>
    %119 = vector.shape_cast %118 : vector<10xf32> to vector<10x1xf32>
    %120 = vector.broadcast %119 : vector<10x1xf32> to vector<10x10xf32>
    %121 = arith.divf %117, %120 : vector<10x10xf32>
    %cst_87 = arith.constant dense<0.000000e+00> : vector<10x8xf32>
    %122 = tpu.matmul %121, %110, %cst_87 {dimension_numbers = #tpu.dot_dimension_numbers<[1], [0], [0], [1], [0, 0, 1, 1], [], []>} : vector<10x10xf32>, vector<10x8xf32>, vector<10x8xf32> -> vector<10x8xf32>
    %123 = arith.truncf %122 : vector<10x8xf32> to vector<10x8xbf16>
    %c3_88 = arith.constant 3 : index
    %c1_89 = arith.constant 1 : index
    %c0_90 = arith.constant 0 : index
    %c0_91 = arith.constant 0 : index
    %124 = vector.load %arg2[%c3_88, %c1_89, %c0_90, %c0_91] : memref<4x4x32x8xbf16, #tpu.memory_space<vmem>>, vector<1x1x32x8xbf16>
    %125 = vector.shape_cast %124 : vector<1x1x32x8xbf16> to vector<32x8xbf16>
    %cst_92 = arith.constant dense<0.000000e+00> : vector<10x32xf32>
    %126 = tpu.matmul %123, %125, %cst_92 {dimension_numbers = #tpu.dot_dimension_numbers<[1], [1], [0], [0], [0, 0, 1, 0], [], []>} : vector<10x8xbf16>, vector<32x8xbf16>, vector<10x32xf32> -> vector<10x32xf32>
    %127 = arith.addf %89, %126 : vector<10x32xf32>
    %c0_93 = arith.constant 0 : index
    %c2_94 = arith.constant 2 : index
    %c0_95 = arith.constant 0 : index
    %c0_96 = arith.constant 0 : index
    %128 = vector.load %arg2[%c0_93, %c2_94, %c0_95, %c0_96] : memref<4x4x32x8xbf16, #tpu.memory_space<vmem>>, vector<1x1x32x8xbf16>
    %129 = vector.shape_cast %128 : vector<1x1x32x8xbf16> to vector<32x8xbf16>
    %cst_97 = arith.constant dense<0.000000e+00> : vector<10x8xf32>
    %130 = tpu.matmul %49, %129, %cst_97 {dimension_numbers = #tpu.dot_dimension_numbers<[1], [0], [0], [1], [0, 0, 1, 1], [], []>} : vector<10x32xbf16>, vector<32x8xbf16>, vector<10x8xf32> -> vector<10x8xf32>
    %c0_98 = arith.constant 0 : index
    %c2_99 = arith.constant 2 : index
    %c0_100 = arith.constant 0 : index
    %c0_101 = arith.constant 0 : index
    %131 = vector.load %arg3[%c0_98, %c2_99, %c0_100, %c0_101] : memref<3x4x1x8xf32, #tpu.memory_space<vmem>>, vector<1x1x1x8xf32>
    %132 = vector.shape_cast %131 : vector<1x1x1x8xf32> to vector<1x8xf32>
    %133 = vector.broadcast %132 : vector<1x8xf32> to vector<10x8xf32>
    %134 = arith.addf %130, %133 : vector<10x8xf32>
    %c1_102 = arith.constant 1 : index
    %c2_103 = arith.constant 2 : index
    %c0_104 = arith.constant 0 : index
    %c0_105 = arith.constant 0 : index
    %135 = vector.load %arg2[%c1_102, %c2_103, %c0_104, %c0_105] : memref<4x4x32x8xbf16, #tpu.memory_space<vmem>>, vector<1x1x32x8xbf16>
    %136 = vector.shape_cast %135 : vector<1x1x32x8xbf16> to vector<32x8xbf16>
    %cst_106 = arith.constant dense<0.000000e+00> : vector<10x8xf32>
    %137 = tpu.matmul %49, %136, %cst_106 {dimension_numbers = #tpu.dot_dimension_numbers<[1], [0], [0], [1], [0, 0, 1, 1], [], []>} : vector<10x32xbf16>, vector<32x8xbf16>, vector<10x8xf32> -> vector<10x8xf32>
    %c1_107 = arith.constant 1 : index
    %c2_108 = arith.constant 2 : index
    %c0_109 = arith.constant 0 : index
    %c0_110 = arith.constant 0 : index
    %138 = vector.load %arg3[%c1_107, %c2_108, %c0_109, %c0_110] : memref<3x4x1x8xf32, #tpu.memory_space<vmem>>, vector<1x1x1x8xf32>
    %139 = vector.shape_cast %138 : vector<1x1x1x8xf32> to vector<1x8xf32>
    %140 = vector.broadcast %139 : vector<1x8xf32> to vector<10x8xf32>
    %141 = arith.addf %137, %140 : vector<10x8xf32>
    %c2_111 = arith.constant 2 : index
    %c2_112 = arith.constant 2 : index
    %c0_113 = arith.constant 0 : index
    %c0_114 = arith.constant 0 : index
    %142 = vector.load %arg2[%c2_111, %c2_112, %c0_113, %c0_114] : memref<4x4x32x8xbf16, #tpu.memory_space<vmem>>, vector<1x1x32x8xbf16>
    %143 = vector.shape_cast %142 : vector<1x1x32x8xbf16> to vector<32x8xbf16>
    %cst_115 = arith.constant dense<0.000000e+00> : vector<10x8xf32>
    %144 = tpu.matmul %49, %143, %cst_115 {dimension_numbers = #tpu.dot_dimension_numbers<[1], [0], [0], [1], [0, 0, 1, 1], [], []>} : vector<10x32xbf16>, vector<32x8xbf16>, vector<10x8xf32> -> vector<10x8xf32>
    %c2_116 = arith.constant 2 : index
    %c2_117 = arith.constant 2 : index
    %c0_118 = arith.constant 0 : index
    %c0_119 = arith.constant 0 : index
    %145 = vector.load %arg3[%c2_116, %c2_117, %c0_118, %c0_119] : memref<3x4x1x8xf32, #tpu.memory_space<vmem>>, vector<1x1x1x8xf32>
    %146 = vector.shape_cast %145 : vector<1x1x1x8xf32> to vector<1x8xf32>
    %147 = vector.broadcast %146 : vector<1x8xf32> to vector<10x8xf32>
    %148 = arith.addf %144, %147 : vector<10x8xf32>
    %cst_120 = arith.constant dense<0.000000e+00> : vector<10x10xf32>
    %149 = tpu.matmul %134, %141, %cst_120 {dimension_numbers = #tpu.dot_dimension_numbers<[1], [1], [0], [0], [0, 0, 1, 0], [], []>} : vector<10x8xf32>, vector<10x8xf32>, vector<10x10xf32> -> vector<10x10xf32>
    %150 = arith.addf %149, %50 : vector<10x10xf32>
    %cst_121 = arith.constant dense<0xFF800000> : vector<10xf32>
    %151 = vector.multi_reduction <maximumf>, %150, %cst_121 [1] : vector<10x10xf32> to vector<10xf32>
    %152 = vector.shape_cast %151 : vector<10xf32> to vector<10x1xf32>
    %153 = vector.broadcast %152 : vector<10x1xf32> to vector<10x10xf32>
    %154 = arith.subf %150, %153 : vector<10x10xf32>
    %155 = math.exp %154 : vector<10x10xf32>
    %cst_122 = arith.constant dense<0.000000e+00> : vector<10xf32>
    %156 = vector.multi_reduction <add>, %155, %cst_122 [1] : vector<10x10xf32> to vector<10xf32>
    %157 = vector.shape_cast %156 : vector<10xf32> to vector<10x1xf32>
    %158 = vector.broadcast %157 : vector<10x1xf32> to vector<10x10xf32>
    %159 = arith.divf %155, %158 : vector<10x10xf32>
    %cst_123 = arith.constant dense<0.000000e+00> : vector<10x8xf32>
    %160 = tpu.matmul %159, %148, %cst_123 {dimension_numbers = #tpu.dot_dimension_numbers<[1], [0], [0], [1], [0, 0, 1, 1], [], []>} : vector<10x10xf32>, vector<10x8xf32>, vector<10x8xf32> -> vector<10x8xf32>
    %161 = arith.truncf %160 : vector<10x8xf32> to vector<10x8xbf16>
    %c3_124 = arith.constant 3 : index
    %c2_125 = arith.constant 2 : index
    %c0_126 = arith.constant 0 : index
    %c0_127 = arith.constant 0 : index
    %162 = vector.load %arg2[%c3_124, %c2_125, %c0_126, %c0_127] : memref<4x4x32x8xbf16, #tpu.memory_space<vmem>>, vector<1x1x32x8xbf16>
    %163 = vector.shape_cast %162 : vector<1x1x32x8xbf16> to vector<32x8xbf16>
    %cst_128 = arith.constant dense<0.000000e+00> : vector<10x32xf32>
    %164 = tpu.matmul %161, %163, %cst_128 {dimension_numbers = #tpu.dot_dimension_numbers<[1], [1], [0], [0], [0, 0, 1, 0], [], []>} : vector<10x8xbf16>, vector<32x8xbf16>, vector<10x32xf32> -> vector<10x32xf32>
    %165 = arith.addf %127, %164 : vector<10x32xf32>
    %c0_129 = arith.constant 0 : index
    %c3_130 = arith.constant 3 : index
    %c0_131 = arith.constant 0 : index
    %c0_132 = arith.constant 0 : index
    %166 = vector.load %arg2[%c0_129, %c3_130, %c0_131, %c0_132] : memref<4x4x32x8xbf16, #tpu.memory_space<vmem>>, vector<1x1x32x8xbf16>
    %167 = vector.shape_cast %166 : vector<1x1x32x8xbf16> to vector<32x8xbf16>
    %cst_133 = arith.constant dense<0.000000e+00> : vector<10x8xf32>
    %168 = tpu.matmul %49, %167, %cst_133 {dimension_numbers = #tpu.dot_dimension_numbers<[1], [0], [0], [1], [0, 0, 1, 1], [], []>} : vector<10x32xbf16>, vector<32x8xbf16>, vector<10x8xf32> -> vector<10x8xf32>
    %c0_134 = arith.constant 0 : index
    %c3_135 = arith.constant 3 : index
    %c0_136 = arith.constant 0 : index
    %c0_137 = arith.constant 0 : index
    %169 = vector.load %arg3[%c0_134, %c3_135, %c0_136, %c0_137] : memref<3x4x1x8xf32, #tpu.memory_space<vmem>>, vector<1x1x1x8xf32>
    %170 = vector.shape_cast %169 : vector<1x1x1x8xf32> to vector<1x8xf32>
    %171 = vector.broadcast %170 : vector<1x8xf32> to vector<10x8xf32>
    %172 = arith.addf %168, %171 : vector<10x8xf32>
    %c1_138 = arith.constant 1 : index
    %c3_139 = arith.constant 3 : index
    %c0_140 = arith.constant 0 : index
    %c0_141 = arith.constant 0 : index
    %173 = vector.load %arg2[%c1_138, %c3_139, %c0_140, %c0_141] : memref<4x4x32x8xbf16, #tpu.memory_space<vmem>>, vector<1x1x32x8xbf16>
    %174 = vector.shape_cast %173 : vector<1x1x32x8xbf16> to vector<32x8xbf16>
    %cst_142 = arith.constant dense<0.000000e+00> : vector<10x8xf32>
    %175 = tpu.matmul %49, %174, %cst_142 {dimension_numbers = #tpu.dot_dimension_numbers<[1], [0], [0], [1], [0, 0, 1, 1], [], []>} : vector<10x32xbf16>, vector<32x8xbf16>, vector<10x8xf32> -> vector<10x8xf32>
    %c1_143 = arith.constant 1 : index
    %c3_144 = arith.constant 3 : index
    %c0_145 = arith.constant 0 : index
    %c0_146 = arith.constant 0 : index
    %176 = vector.load %arg3[%c1_143, %c3_144, %c0_145, %c0_146] : memref<3x4x1x8xf32, #tpu.memory_space<vmem>>, vector<1x1x1x8xf32>
    %177 = vector.shape_cast %176 : vector<1x1x1x8xf32> to vector<1x8xf32>
    %178 = vector.broadcast %177 : vector<1x8xf32> to vector<10x8xf32>
    %179 = arith.addf %175, %178 : vector<10x8xf32>
    %c2_147 = arith.constant 2 : index
    %c3_148 = arith.constant 3 : index
    %c0_149 = arith.constant 0 : index
    %c0_150 = arith.constant 0 : index
    %180 = vector.load %arg2[%c2_147, %c3_148, %c0_149, %c0_150] : memref<4x4x32x8xbf16, #tpu.memory_space<vmem>>, vector<1x1x32x8xbf16>
    %181 = vector.shape_cast %180 : vector<1x1x32x8xbf16> to vector<32x8xbf16>
    %cst_151 = arith.constant dense<0.000000e+00> : vector<10x8xf32>
    %182 = tpu.matmul %49, %181, %cst_151 {dimension_numbers = #tpu.dot_dimension_numbers<[1], [0], [0], [1], [0, 0, 1, 1], [], []>} : vector<10x32xbf16>, vector<32x8xbf16>, vector<10x8xf32> -> vector<10x8xf32>
    %c2_152 = arith.constant 2 : index
    %c3_153 = arith.constant 3 : index
    %c0_154 = arith.constant 0 : index
    %c0_155 = arith.constant 0 : index
    %183 = vector.load %arg3[%c2_152, %c3_153, %c0_154, %c0_155] : memref<3x4x1x8xf32, #tpu.memory_space<vmem>>, vector<1x1x1x8xf32>
    %184 = vector.shape_cast %183 : vector<1x1x1x8xf32> to vector<1x8xf32>
    %185 = vector.broadcast %184 : vector<1x8xf32> to vector<10x8xf32>
    %186 = arith.addf %182, %185 : vector<10x8xf32>
    %cst_156 = arith.constant dense<0.000000e+00> : vector<10x10xf32>
    %187 = tpu.matmul %172, %179, %cst_156 {dimension_numbers = #tpu.dot_dimension_numbers<[1], [1], [0], [0], [0, 0, 1, 0], [], []>} : vector<10x8xf32>, vector<10x8xf32>, vector<10x10xf32> -> vector<10x10xf32>
    %188 = arith.addf %187, %50 : vector<10x10xf32>
    %cst_157 = arith.constant dense<0xFF800000> : vector<10xf32>
    %189 = vector.multi_reduction <maximumf>, %188, %cst_157 [1] : vector<10x10xf32> to vector<10xf32>
    %190 = vector.shape_cast %189 : vector<10xf32> to vector<10x1xf32>
    %191 = vector.broadcast %190 : vector<10x1xf32> to vector<10x10xf32>
    %192 = arith.subf %188, %191 : vector<10x10xf32>
    %193 = math.exp %192 : vector<10x10xf32>
    %cst_158 = arith.constant dense<0.000000e+00> : vector<10xf32>
    %194 = vector.multi_reduction <add>, %193, %cst_158 [1] : vector<10x10xf32> to vector<10xf32>
    %195 = vector.shape_cast %194 : vector<10xf32> to vector<10x1xf32>
    %196 = vector.broadcast %195 : vector<10x1xf32> to vector<10x10xf32>
    %197 = arith.divf %193, %196 : vector<10x10xf32>
    %cst_159 = arith.constant dense<0.000000e+00> : vector<10x8xf32>
    %198 = tpu.matmul %197, %186, %cst_159 {dimension_numbers = #tpu.dot_dimension_numbers<[1], [0], [0], [1], [0, 0, 1, 1], [], []>} : vector<10x10xf32>, vector<10x8xf32>, vector<10x8xf32> -> vector<10x8xf32>
    %199 = arith.truncf %198 : vector<10x8xf32> to vector<10x8xbf16>
    %c3_160 = arith.constant 3 : index
    %c3_161 = arith.constant 3 : index
    %c0_162 = arith.constant 0 : index
    %c0_163 = arith.constant 0 : index
    %200 = vector.load %arg2[%c3_160, %c3_161, %c0_162, %c0_163] : memref<4x4x32x8xbf16, #tpu.memory_space<vmem>>, vector<1x1x32x8xbf16>
    %201 = vector.shape_cast %200 : vector<1x1x32x8xbf16> to vector<32x8xbf16>
    %cst_164 = arith.constant dense<0.000000e+00> : vector<10x32xf32>
    %202 = tpu.matmul %199, %201, %cst_164 {dimension_numbers = #tpu.dot_dimension_numbers<[1], [1], [0], [0], [0, 0, 1, 0], [], []>} : vector<10x8xbf16>, vector<32x8xbf16>, vector<10x32xf32> -> vector<10x32xf32>
    %203 = arith.addf %165, %202 : vector<10x32xf32>
    %204 = arith.addf %26, %203 : vector<10x32xf32>
    %c4 = arith.constant 4 : index
    %c0_165 = arith.constant 0 : index
    %205 = vector.load %arg5[%c4, %c0_165] : memref<48x128xf32, #tpu.memory_space<vmem>>, vector<1x32xf32>
    %206 = vector.broadcast %205 : vector<1x32xf32> to vector<10x32xf32>
    %207 = arith.addf %204, %206 : vector<10x32xf32>
    %c5 = arith.constant 5 : index
    %c0_166 = arith.constant 0 : index
    %208 = vector.load %arg5[%c5, %c0_166] : memref<48x128xf32, #tpu.memory_space<vmem>>, vector<1x32xf32>
    %c6 = arith.constant 6 : index
    %c0_167 = arith.constant 0 : index
    %209 = vector.load %arg5[%c6, %c0_167] : memref<48x128xf32, #tpu.memory_space<vmem>>, vector<1x32xf32>
    %cst_168 = arith.constant dense<0.000000e+00> : vector<10xf32>
    %210 = vector.multi_reduction <add>, %207, %cst_168 [1] : vector<10x32xf32> to vector<10xf32>
    %211 = vector.shape_cast %210 : vector<10xf32> to vector<10x1xf32>
    %cst_169 = arith.constant 3.200000e+01 : f32
    %212 = vector.broadcast %cst_169 : f32 to vector<10x1xf32>
    %213 = arith.divf %211, %212 : vector<10x1xf32>
    %214 = vector.broadcast %213 : vector<10x1xf32> to vector<10x32xf32>
    %215 = arith.subf %207, %214 : vector<10x32xf32>
    %216 = arith.mulf %215, %215 : vector<10x32xf32>
    %cst_170 = arith.constant dense<0.000000e+00> : vector<10xf32>
    %217 = vector.multi_reduction <add>, %216, %cst_170 [1] : vector<10x32xf32> to vector<10xf32>
    %218 = vector.shape_cast %217 : vector<10xf32> to vector<10x1xf32>
    %cst_171 = arith.constant 3.200000e+01 : f32
    %219 = vector.broadcast %cst_171 : f32 to vector<10x1xf32>
    %220 = arith.divf %218, %219 : vector<10x1xf32>
    %cst_172 = arith.constant 9.99999974E-6 : f32
    %221 = vector.broadcast %cst_172 : f32 to vector<10x1xf32>
    %222 = arith.addf %220, %221 : vector<10x1xf32>
    %223 = math.rsqrt %222 : vector<10x1xf32>
    %224 = vector.broadcast %223 : vector<10x1xf32> to vector<10x32xf32>
    %225 = arith.mulf %215, %224 : vector<10x32xf32>
    %226 = vector.broadcast %208 : vector<1x32xf32> to vector<10x32xf32>
    %227 = arith.mulf %225, %226 : vector<10x32xf32>
    %228 = vector.broadcast %209 : vector<1x32xf32> to vector<10x32xf32>
    %229 = arith.addf %227, %228 : vector<10x32xf32>
    %230 = arith.truncf %229 : vector<10x32xf32> to vector<10x32xbf16>
    %c192 = arith.constant 192 : index
    %c0_173 = arith.constant 0 : index
    %231 = vector.load %arg4[%c192, %c0_173] : memref<384x128xbf16, #tpu.memory_space<vmem>>, vector<32x128xbf16>
    %cst_174 = arith.constant dense<0.000000e+00> : vector<10x128xf32>
    %232 = tpu.matmul %230, %231, %cst_174 {dimension_numbers = #tpu.dot_dimension_numbers<[1], [0], [0], [1], [0, 0, 1, 1], [], []>} : vector<10x32xbf16>, vector<32x128xbf16>, vector<10x128xf32> -> vector<10x128xf32>
    %c7 = arith.constant 7 : index
    %c0_175 = arith.constant 0 : index
    %233 = vector.load %arg5[%c7, %c0_175] : memref<48x128xf32, #tpu.memory_space<vmem>>, vector<1x128xf32>
    %234 = vector.broadcast %233 : vector<1x128xf32> to vector<10x128xf32>
    %235 = arith.addf %232, %234 : vector<10x128xf32>
    %cst_176 = arith.constant 1.702000e+00 : f32
    %236 = vector.broadcast %cst_176 : f32 to vector<10x128xf32>
    %237 = arith.mulf %236, %235 : vector<10x128xf32>
    %238 = arith.negf %237 : vector<10x128xf32>
    %239 = math.exp %238 : vector<10x128xf32>
    %cst_177 = arith.constant 1.000000e+00 : f32
    %240 = vector.broadcast %cst_177 : f32 to vector<10x128xf32>
    %241 = arith.addf %240, %239 : vector<10x128xf32>
    %242 = arith.divf %240, %241 : vector<10x128xf32>
    %243 = arith.mulf %235, %242 : vector<10x128xf32>
    %244 = arith.truncf %243 : vector<10x128xf32> to vector<10x128xbf16>
    %c224 = arith.constant 224 : index
    %c0_178 = arith.constant 0 : index
    %245 = vector.load %arg4[%c224, %c0_178] : memref<384x128xbf16, #tpu.memory_space<vmem>>, vector<128x32xbf16>
    %cst_179 = arith.constant dense<0.000000e+00> : vector<10x32xf32>
    %246 = tpu.matmul %244, %245, %cst_179 {dimension_numbers = #tpu.dot_dimension_numbers<[1], [0], [0], [1], [0, 0, 1, 1], [], []>} : vector<10x128xbf16>, vector<128x32xbf16>, vector<10x32xf32> -> vector<10x32xf32>
    %c8 = arith.constant 8 : index
    %c0_180 = arith.constant 0 : index
    %247 = vector.load %arg5[%c8, %c0_180] : memref<48x128xf32, #tpu.memory_space<vmem>>, vector<1x32xf32>
    %248 = vector.broadcast %247 : vector<1x32xf32> to vector<10x32xf32>
    %249 = arith.addf %246, %248 : vector<10x32xf32>
    %250 = arith.addf %207, %249 : vector<10x32xf32>
    %c9 = arith.constant 9 : index
    %c0_181 = arith.constant 0 : index
    %251 = vector.load %arg5[%c9, %c0_181] : memref<48x128xf32, #tpu.memory_space<vmem>>, vector<1x32xf32>
    %c10 = arith.constant 10 : index
    %c0_182 = arith.constant 0 : index
    %252 = vector.load %arg5[%c10, %c0_182] : memref<48x128xf32, #tpu.memory_space<vmem>>, vector<1x32xf32>
    %cst_183 = arith.constant dense<0.000000e+00> : vector<10xf32>
    %253 = vector.multi_reduction <add>, %250, %cst_183 [1] : vector<10x32xf32> to vector<10xf32>
    %254 = vector.shape_cast %253 : vector<10xf32> to vector<10x1xf32>
    %cst_184 = arith.constant 3.200000e+01 : f32
    %255 = vector.broadcast %cst_184 : f32 to vector<10x1xf32>
    %256 = arith.divf %254, %255 : vector<10x1xf32>
    %257 = vector.broadcast %256 : vector<10x1xf32> to vector<10x32xf32>
    %258 = arith.subf %250, %257 : vector<10x32xf32>
    %259 = arith.mulf %258, %258 : vector<10x32xf32>
    %cst_185 = arith.constant dense<0.000000e+00> : vector<10xf32>
    %260 = vector.multi_reduction <add>, %259, %cst_185 [1] : vector<10x32xf32> to vector<10xf32>
    %261 = vector.shape_cast %260 : vector<10xf32> to vector<10x1xf32>
    %cst_186 = arith.constant 3.200000e+01 : f32
    %262 = vector.broadcast %cst_186 : f32 to vector<10x1xf32>
    %263 = arith.divf %261, %262 : vector<10x1xf32>
    %cst_187 = arith.constant 9.99999974E-6 : f32
    %264 = vector.broadcast %cst_187 : f32 to vector<10x1xf32>
    %265 = arith.addf %263, %264 : vector<10x1xf32>
    %266 = math.rsqrt %265 : vector<10x1xf32>
    %267 = vector.broadcast %266 : vector<10x1xf32> to vector<10x32xf32>
    %268 = arith.mulf %258, %267 : vector<10x32xf32>
    %269 = vector.broadcast %251 : vector<1x32xf32> to vector<10x32xf32>
    %270 = arith.mulf %268, %269 : vector<10x32xf32>
    %271 = vector.broadcast %252 : vector<1x32xf32> to vector<10x32xf32>
    %272 = arith.addf %270, %271 : vector<10x32xf32>
    %273 = arith.truncf %272 : vector<10x32xf32> to vector<10x32xbf16>
    %c352 = arith.constant 352 : index
    %c0_188 = arith.constant 0 : index
    %274 = vector.load %arg4[%c352, %c0_188] : memref<384x128xbf16, #tpu.memory_space<vmem>>, vector<32x16xbf16>
    %cst_189 = arith.constant dense<0.000000e+00> : vector<10x16xf32>
    %275 = tpu.matmul %273, %274, %cst_189 {dimension_numbers = #tpu.dot_dimension_numbers<[1], [0], [0], [1], [0, 0, 1, 1], [], []>} : vector<10x32xbf16>, vector<32x16xbf16>, vector<10x16xf32> -> vector<10x16xf32>
    %c0_190 = arith.constant 0 : index
    %c0_191 = arith.constant 0 : index
    %276 = vector.load %arg6[%c0_190, %c0_191] : memref<10x16xf32, #tpu.memory_space<vmem>>, vector<10x16xf32>
    tpu.vector_store %arg6[%c0_190, %c0_191], %275 {strides = array<i32>} : memref<10x16xf32, #tpu.memory_space<vmem>>, vector<10x16xf32>,
    return
  }
  func.func @transform_0(%arg0: i32) -> (i32, i32) {
    %c0_i32 = arith.constant 0 : i32
    %c0_i32_0 = arith.constant 0 : i32
    %c0_i32_1 = arith.constant 0 : i32
    return %c0_i32, %c0_i32_0 : i32, i32
  }
  func.func @transform_1(%arg0: i32) -> (i32, i32, i32, i32) {
    %c0_i32 = arith.constant 0 : i32
    %c0_i32_0 = arith.constant 0 : i32
    %c0_i32_1 = arith.constant 0 : i32
    %c0_i32_2 = arith.constant 0 : i32
    %c0_i32_3 = arith.constant 0 : i32
    return %c0_i32, %c0_i32_0, %c0_i32_1, %c0_i32_2 : i32, i32, i32, i32
  }
  func.func @transform_2(%arg0: i32) -> (i32, i32, i32, i32) {
    %c0_i32 = arith.constant 0 : i32
    %c0_i32_0 = arith.constant 0 : i32
    %c0_i32_1 = arith.constant 0 : i32
    %c0_i32_2 = arith.constant 0 : i32
    %c0_i32_3 = arith.constant 0 : i32
    return %c0_i32, %c0_i32_0, %c0_i32_1, %c0_i32_2 : i32, i32, i32, i32
  }
  func.func @transform_3(%arg0: i32) -> (i32, i32) {
    %c0_i32 = arith.constant 0 : i32
    %c0_i32_0 = arith.constant 0 : i32
    %c0_i32_1 = arith.constant 0 : i32
    return %c0_i32, %c0_i32_0 : i32, i32
  }
  func.func @transform_4(%arg0: i32) -> (i32, i32) {
    %c0_i32 = arith.constant 0 : i32
    %c0_i32_0 = arith.constant 0 : i32
    %c0_i32_1 = arith.constant 0 : i32
    return %c0_i32, %c0_i32_0 : i32, i32
  }
  func.func @transform_5(%arg0: i32) -> (i32, i32) {
    %c0_i32 = arith.constant 0 : i32
    %c0_i32_0 = arith.constant 0 : i32
    %c0_i32_1 = arith.constant 0 : i32
    return %c0_i32, %c0_i32_0 : i32, i32
  }
}

</mosaic_0001>

<bundles_post_ra>
// kernel: encode_image.1
= control target key start
LH: loop header
LB: loop body
LE: loop exit
PB: predicated region body
PF: predicated region fallthrough
CT: control target
= control target key end

     0   :  { %v3134_v0 = vmov 0   ;;  %vm130_vm0 = vcmask 523264   ;;  %vm177_vm1 = vcmask 261120   ;;  %vm181_vm2 = vcmask 254976   ;;  %s3694_s3 = inlined_call_operand.vmem [shape: bf16[384,128], index: 3, kind: input, shape index: {}]   ;;  %s3695_s0 = inlined_call_operand.vmem [shape: bf16[10,192], index: 0, kind: input, shape index: {}]   ;;  %s3696_s4 = inlined_call_operand.vmem [shape: f32[48,128], index: 4, kind: input, shape index: {}]   ;;  %s3697_s1 = inlined_call_operand.vmem [shape: bf16[4,4,32,8], index: 1, kind: input, shape index: {}]   ;;  %s3698_s2 = inlined_call_operand.vmem [shape: f32[3,4,1,8], index: 2, kind: input, shape index: {}]   ;;  %s3699_s5 = inlined_call_operand.vmem [shape: f32[10,16], index: 5, kind: output, shape index: {}]  }
   0x1   :  { %134 = vmatprep.subr.bf16.mxu0 %v3134_v0  ;;  %v3019_v1 = vld [vmem:[%s3694_s3] sm:$0xff]   ;;  %v3020_v2 = vld [vmem:[%s3694_s3 + $0x8] sm:$0xff]   ;;  %v3021_v3 = vld [vmem:[%s3694_s3 + $0x10] sm:$0xff]   ;;  %vm3136_vm3 = vmmov 0   ;;  %vm460_vm4 = vcmask 64512   ;;  %vm578_vm6 = vcmask 1041408  }
   0x2   :  { %135 = vmatpush1.bf16.msra.mxu0 %v3019_v1  ;;  %v3022_v4 = vld [vmem:[%s3694_s3 + $0x18] sm:$0xff]   ;;  %v3023_v5 = vld [vmem:[%s3694_s3 + $0x20] sm:$0xff]   ;;  %v3024_v7 = vld [vmem:[%s3694_s3 + $0x28] sm:$0xff]   ;;  %vm3137_vm7 = vmmov 1   ;;  %vm552_vm9 = vcmask 74752   ;;  %vm548_vm10 = vcmask 80896  }
   0x3   :  { %136 = vmatprep.subr.bf16.mxu0 %v3134_v0  ;;  %v3033_v6 = vld [vmem:[%s3695_s0 + $0x4] ss:$8 sps:$4 sm:$0x1f]   ;;  %v3025_v8 = vld [vmem:[%s3694_s3 + $0x30] sm:$0xff]   ;;  %v3026_v9 = vld [vmem:[%s3694_s3 + $0x38] sm:$0xff]   ;;  %vm2443_vm11 = vcmask 130048  }
   0x4   :  { %2465 = vmatprep.mubr.msk.bf16.mxu0 %vm130_vm0, %v3033_v6  ;;  %v3027_v10 = vld [vmem:[%s3694_s3 + $0x40] sm:$0xff]   ;;  %v3028_v11 = vld [vmem:[%s3694_s3 + $0x48] sm:$0xff]   ;;  %v3029_v12 = vld [vmem:[%s3694_s3 + $0x50] sm:$0xff]   ;;  %vm2445_vm12 = vcmask 123904  }
   0x5   :  { %v3030_v13 = vld [vmem:[%s3694_s3 + $0x58] sm:$0xff]   ;;  %v3031_v14 = vld [vmem:[%s3695_s0] ss:$8 sps:$4 sm:$0x1f]   ;;  %v47_v15 = vld [vmem:[%s3696_s4 + $0x10] sm:$0xff] }
   0x6   :  { %137 = vmatpush1.bf16.msra.mxu0 %v3020_v2  ;;  %v48_v17 = vld [vmem:[%s3696_s4 + $0x18] sm:$0x3]  ;;  %v2466_v42 = vld [vmem:[%s3696_s4] ss:$0 sm:$0xff]  ;;  %v2467_v44 = vld [vmem:[%s3696_s4 + $0x1] ss:$0 sm:$0xff] }
   0x7   :  { %138 = vmatprep.subr.bf16.mxu0 %v3134_v0  ;;  %v3034_v63 = vld [vmem:[%s3697_s1] sm:$0xff]   ;;  %v3036_v2 = vld [vmem:[%s3697_s1 + $0x8] sm:$0xff]   ;;  %vm3303_vm5 = vmpackc.low %vm460_vm4, %vm460_vm4 }
   0x8   :  { %v3035_v1 = vld [vmem:[%s3697_s1 + $0x40] sm:$0xff]   ;;  %vm3317_vm8 = vmpackc.low %vm578_vm6, %vm3137_vm7 }
   0xa   :  { %139 = vmatpush1.bf16.msra.mxu0 %v3021_v3  ;;  %v3037_v3 = vld [vmem:[%s3697_s1 + $0x48] sm:$0xff]  }
   0xb   :  { %140 = vmatprep.subr.bf16.mxu0 %v3134_v0 }
   0xe   :  { %141 = vmatpush1.bf16.msra.mxu0 %v3022_v4 }
   0xf   :  { %142 = vmatprep.subr.bf16.mxu0 %v3134_v0 }
  0x12   :  { %143 = vmatpush1.bf16.msra.mxu0 %v3023_v5 }
  0x13   :  { %144 = vmatprep.subr.bf16.mxu0 %v3134_v0 }
  0x16   :  { %145 = vmatpush1.bf16.msra.mxu0 %v3024_v7 }
  0x17   :  { %146 = vmatprep.subr.bf16.mxu0 %v3134_v0 }
  0x1a   :  { %147 = vmatpush1.bf16.msra.mxu0 %v3025_v8 }
  0x1b   :  { %148 = vmatprep.subr.bf16.mxu0 %v3134_v0 }
  0x1e   :  { %149 = vmatpush1.bf16.msra.mxu0 %v3026_v9 }
  0x1f   :  { %150 = vmatprep.subr.bf16.mxu0 %v3134_v0 }
  0x22   :  { %151 = vmatpush1.bf16.msra.mxu0 %v3027_v10 }
  0x23   :  { %152 = vmatprep.subr.bf16.mxu0 %v3134_v0 }
  0x26   :  { %153 = vmatpush1.bf16.msra.mxu0 %v3028_v11 }
  0x27   :  { %154 = vmatprep.subr.bf16.mxu0 %v3134_v0 }
  0x2a   :  { %155 = vmatpush1.bf16.msra.mxu0 %v3029_v12  ;;  %v2468_v12 = vld [vmem:[%s3696_s4 + $0x2] ss:$0 sm:$0xff] }
  0x2b   :  { %156 = vmatprep.subr.bf16.mxu0 %v3134_v0  ;;  %v3135_v0 = vmov 0.0  }
  0x2c   :  { %2755 = vmatprep.subr.bf16.mxu1 %v3135_v0  ;;  %2759 = vmatprep.mubr.msk.bf16.mxu1 %vm3136_vm3, %v3135_v0 }
  0x2d   :  { %2756 = vmatpush3.bf16.msra.mxu1 %v3035_v1 }
  0x2e   :  { %157 = vmatpush1.bf16.msra.mxu0 %v3030_v13  ;;  %2757 = vmatprep.subr.bf16.mxu1 %v3135_v0 }
  0x2f   :  { %2747 = vmatprep.subr.bf16.mxu0 %v3135_v0 }
  0x31   :  { %167 = vmatmul.mubr.bf16.vlgmr.msra.gmra.mrb[0].mxu0 %v3031_v14  ;;  %2758 = vmatpush3.bf16.msra.mxu1 %v3037_v3 }
  0x32   :  { %2748 = vmatpush3.bf16.msra.mxu0 %v3034_v63  ;;  %2751 = vmatprep.mubr.msk.bf16.mxu0 %vm3136_vm3, %v3135_v0 }
  0x33   :  { %2749 = vmatprep.subr.bf16.mxu0 %v3135_v0  ;;  %2763 = vmatprep.subr.bf16.mxu1 %v3135_v0 }
  0x36   :  { %2750 = vmatpush3.bf16.msra.mxu0 %v3036_v2 }
  0x37   :  { %2801 = vmatprep.subr.bf16.mxu0 %v3135_v0 }
 0x104   :  { %v168_v16 = vpop.f32.mrb[0].mxu0 }
 0x105   :  { %v169_v18 = vadd.f32 %v168_v16, %v47_v15  ;;  %v170_v19 = vpop.f32.mrb[1].mxu0  ;;  %v2469_v16 = vld [vmem:[%s3696_s4 + $0x3] ss:$0 sm:$0xff] }
 0x106   :  { %v171_v20 = vpop.f32.mrb[2].mxu0 }
 0x107   :  { %v172_v21 = vadd.f32 %v171_v20, %v48_v17  ;;  %v173_v22 = vpop.f32.mrb[3].mxu0  ;;  %v178_v23 = vsel %vm177_vm1, %v169_v18, 0.0  ;;  %v3038_v20 = vld [vmem:[%s3697_s1 + $0x80] sm:$0xff]  }
 0x108   :  { %179 = vadd.xlane.f32.xlu0 %v178_v23  ;;  %v3040_v23 = vld [vmem:[%s3697_s1 + $0x88] sm:$0xff]  }
 0x109   :  { %v182_v24 = vsel %vm181_vm2, %v172_v21, 0.0 }
 0x10c   :  { %183 = vadd.xlane.f32.xlu0 %v182_v24  ;;  %v3041_v24 = vld [vmem:[%s3697_s1 + $0x98] sm:$0xff]  }
 0x195   :  { %v180_v25 = vpop.xlane.xlu0 %179 }
 0x196   :  { %v186_v26 = vmul.f32 0.03125, %v180_v25  ;;  %v2470_v25 = vld [vmem:[%s3698_s2] ss:$0 sm:$0xff] }
 0x198   :  { %v188_v27 = vsub.f32 %v169_v18, %v186_v26 }
 0x199   :  { %v184_v28 = vpop.xlane.xlu0 %183 }
 0x19a   :  { %v187_v29 = vmul.f32 0.03125, %v184_v28  ;;  %v190_v30 = vmul.f32 %v188_v27, %v188_v27 }
 0x19c   :  { %v189_v31 = vsub.f32 %v172_v21, %v187_v29  ;;  %v192_v32 = vsel %vm177_vm1, %v190_v30, 0.0  ;;  %v3039_v21 = vld [vmem:[%s3697_s1 + $0x90] sm:$0xff]  }
 0x19d   :  { %193 = vadd.xlane.f32.xlu1 %v192_v32 }
 0x19e   :  { %v191_v33 = vmul.f32 %v189_v31, %v189_v31 }
 0x1a0   :  { %v195_v34 = vsel %vm181_vm2, %v191_v33, 0.0 }
 0x1a1   :  { %196 = vadd.xlane.f32.xlu1 %v195_v34 }
 0x22a   :  { %v194_v35 = vpop.xlane.xlu1 %193 }
 0x22b   :  { %v198_v36 = vmul.f32 0.03125, %v194_v35 }
 0x22d   :  { %v200_v37 = vadd.f32 1e-05, %v198_v36 }
 0x22e   :  { %v197_v38 = vpop.xlane.xlu1 %196 }
 0x22f   :  { %3078 = vrsqrt.f32 %v200_v37  ;;  %v199_v39 = vmul.f32 0.03125, %v197_v38  ;;  %v2611_v38 = vld [vmem:[%s3698_s2 + $0xb] ss:$0 sm:$0xff] }
 0x231   :  { %v201_v40 = vadd.f32 1e-05, %v199_v39 }
 0x233   :  { %3080 = vrsqrt.f32 %v201_v40  ;;  %v2488_v40 = vld [vmem:[%s3698_s2 + $0x8] ss:$0 sm:$0xff] }
 0x239   :  { %v3079_v41 = vpop.eup %3078 }
 0x23a   :  { %v204_v43 = vmul.f32 %v3079_v41, %v188_v27  ;;  %v2479_v27 = vld [vmem:[%s3698_s2 + $0x4] ss:$0 sm:$0xff] }
 0x23c   :  { %v210_v45 = vmul.f32 %v2466_v42, %v204_v43 }
 0x23d   :  { %v3081_v46 = vpop.eup %3080 }
 0x23e   :  { %v3226_v47 = vadd.f32 %v2467_v44, %v210_v45  ;;  %v205_v48 = vmul.f32 %v3081_v46, %v189_v31 }
 0x240   :  { %v220_v49 = vsel %vm177_vm1, %v3226_v47, 0.0  ;;  %v211_v50 = vmul.f32 %v2466_v42, %v205_v48  ;;  %v2526_v42 = vld [vmem:[%s3698_s2 + $0x9] ss:$0 sm:$0xff] }
 0x241   :  { %221 = vadd.xlane.f32.xlu0 %v220_v49 }
 0x242   :  { %v3230_v51 = vadd.f32 %v2467_v44, %v211_v50 }
 0x244   :  { %v223_v52 = vsel %vm181_vm2, %v3230_v51, 0.0 }
 0x245   :  { %224 = vadd.xlane.f32.xlu1 %v223_v52 }
 0x2ce   :  { %v222_v53 = vpop.xlane.xlu0 %221 }
 0x2cf   :  { %v226_v54 = vmul.f32 0.03125, %v222_v53 }
 0x2d1   :  { %v228_v55 = vsub.f32 %v3226_v47, %v226_v54 }
 0x2d2   :  { %v225_v56 = vpop.xlane.xlu1 %224 }
 0x2d3   :  { %v227_v57 = vmul.f32 0.03125, %v225_v56  ;;  %v230_v58 = vmul.f32 %v228_v55, %v228_v55 }
 0x2d5   :  { %v229_v59 = vsub.f32 %v3230_v51, %v227_v57  ;;  %v232_v60 = vsel %vm177_vm1, %v230_v58, 0.0 }
 0x2d6   :  { %233 = vadd.xlane.f32.xlu0 %v232_v60  ;;  %v3335_v60 = vld [vmem:[%s3696_s4 + $0x28] sm:$0x3] }
 0x2d7   :  { %v231_v61 = vmul.f32 %v229_v59, %v229_v59 }
 0x2d9   :  { %v235_v62 = vsel %vm181_vm2, %v231_v61, 0.0  ;;  %v3340_v61 = vld [vmem:[%s3696_s4 + $0x20] sm:$0xff] }
 0x2da   :  { %236 = vadd.xlane.f32.xlu1 %v235_v62 }
 0x363   :  { %v234_v4 = vpop.xlane.xlu0 %233 }
 0x364   :  { %v238_v5 = vmul.f32 0.03125, %v234_v4 }
 0x366   :  { %v240_v6 = vadd.f32 1e-05, %v238_v5 }
 0x367   :  { %v237_v7 = vpop.xlane.xlu1 %236 }
 0x368   :  { %3082 = vrsqrt.f32 %v240_v6  ;;  %v239_v8 = vmul.f32 0.03125, %v237_v7 }
 0x36a   :  { %v241_v9 = vadd.f32 1e-05, %v239_v8 }
 0x36c   :  { %3084 = vrsqrt.f32 %v241_v9 }
 0x372   :  { %v3083_v10 = vpop.eup %3082 }
 0x373   :  { %v244_v11 = vmul.f32 %v3083_v10, %v228_v55 }
 0x375   :  { %v250_v14 = vmul.f32 %v2468_v12, %v244_v11 }
 0x376   :  { %v3085_v13 = vpop.eup %3084 }
 0x377   :  { %v245_v15 = vmul.f32 %v3085_v13, %v229_v59  ;;  %v256_v18 = vadd.f32 %v2469_v16, %v250_v14 }
 0x379   :  { %v251_v17 = vmul.f32 %v2468_v12, %v245_v15 }
 0x37b   :  { %v257_v19 = vadd.f32 %v2469_v16, %v251_v17 }
 0x37d   :  { %v3272_v22 = vpack.c.bf16 %v257_v19, %v256_v18 }
 0x37f   :  { %2752 = vmatmul.mubr.msk.bf16.vlgmr.msra.gmra.mrb[4].mxu0 %vm177_vm1, %v3272_v22  ;;  %2760 = vmatmul.mubr.msk.bf16.vlgmr.msra.gmra.mrb[0].mxu1 %vm177_vm1, %v3272_v22 }
 0x380   :  { %2764 = vmatpush3.bf16.msra.mxu1 %v3038_v20  ;;  %2802 = vmatpush3.bf16.msra.mxu0 %v3039_v21  ;;  %v3042_v20 = vld [vmem:[%s3697_s1 + $0x10] sm:$0xff]  }
 0x381   :  { %2765 = vmatprep.subr.bf16.mxu1 %v3135_v0  ;;  %2803 = vmatprep.subr.bf16.mxu0 %v3135_v0 }
 0x382   :  { %2767 = vmatprep.mubr.msk.bf16.mxu1 %vm3136_vm3, %v3135_v0  ;;  %2805 = vmatprep.mubr.msk.bf16.mxu0 %vm3136_vm3, %v3135_v0 }
 0x384   :  { %2766 = vmatpush3.bf16.msra.mxu1 %v3040_v23  ;;  %2804 = vmatpush3.bf16.msra.mxu0 %v3041_v24  ;;  %v3043_v23 = vld [vmem:[%s3697_s1 + $0x18] sm:$0xff]   ;;  %v3044_v24 = vld [vmem:[%s3697_s1 + $0x50] sm:$0xff]  }
 0x387   :  { %2768 = vmatmul.mubr.msk.bf16.vlgmr.msra.gmra.mrb[4].mxu1 %vm177_vm1, %v3272_v22  ;;  %2806 = vmatmul.mubr.msk.bf16.vlgmr.msra.gmra.mrb[8].mxu0 %vm177_vm1, %v3272_v22 }
 0x452   :  { %v321_v26 = vpop.f32.mrb[4].mxu0  ;;  %v387_v28 = vpop.f32.mrb[0].mxu1 }
 0x453   :  { %v322_v29 = vadd.f32 %v2470_v25, %v321_v26  ;;  %v2753_v30 = vpop.f32.mrb[5].mxu0  ;;  %v2761_v31 = vpop.f32.mrb[1].mxu1  ;;  %v388_v34 = vadd.f32 %v2479_v27, %v387_v28 }
 0x454   :  { %v324_v32 = vpop.f32.mrb[6].mxu0  ;;  %v390_v33 = vpop.f32.mrb[2].mxu1 }
 0x455   :  { %v391_v35 = vadd.f32 %v2479_v27, %v390_v33  ;;  %v2754_v36 = vpop.f32.mrb[7].mxu0  ;;  %v2762_v37 = vpop.f32.mrb[3].mxu1  ;;  %2775 = vmatprep.mubr.msk.f32.mxu1 %vm460_vm4, %v322_v29  ;;  %v325_v57 = vadd.f32 %v2470_v25, %v324_v32  ;;  %v3045_v25 = vld [vmem:[%s3697_s1 + $0x58] sm:$0xff]   ;;  %v2508_v29 = vld [vmem:[%s3698_s2 + $0x1] ss:$0 sm:$0xff] }
 0x457   :  { %v2967_v39 = vpack.c.bf16 %v391_v35, %v388_v34  ;;  %v2517_v35 = vld [vmem:[%s3698_s2 + $0x5] ss:$0 sm:$0xff] }
 0x459   :  { %2969 = vmatprep.subr.msk.bf16.mxu1 %vm3303_vm5, %v2967_v39 }
 0x45a   :  { %v453_v41 = vpop.f32.mrb[4].mxu1  ;;  %2972 = vmatpush3.bf16.xpose.msk.msra.mxu1 %vm3303_vm5, %v2967_v39  ;;  %v854_v43 = vpop.f32.mrb[8].mxu0 }
 0x45b   :  { %v2769_v44 = vpop.f32.mrb[5].mxu1  ;;  %v2807_v45 = vpop.f32.mrb[9].mxu0  ;;  %v454_v49 = vadd.f32 %v2488_v40, %v453_v41  ;;  %v855_v50 = vadd.f32 %v2526_v42, %v854_v43 }
 0x45c   :  { %v456_v46 = vpop.f32.mrb[6].mxu1  ;;  %v857_v48 = vpop.f32.mrb[10].mxu0 }
 0x45d   :  { %v457_v52 = vadd.f32 %v2488_v40, %v456_v46  ;;  %v858_v53 = vadd.f32 %v2526_v42, %v857_v48  ;;  %v2770_v54 = vpop.f32.mrb[7].mxu1  ;;  %v2808_v55 = vpop.f32.mrb[11].mxu0 }
 0x45f   :  { %v2973_v58 = vpack.c.bf16 %v457_v52, %v454_v49  ;;  %v2985_v59 = vpack.c.bf16 %v858_v53, %v855_v50 }
 0x461   :  { %2776 = vmatmul.mubr.msk.f32.vlgmr.msra.gmra.mrb[8].mxu1 %vm460_vm4, %v325_v57  ;;  %2975 = vmatprep.subr.msk.bf16.mxu1 %vm3317_vm8, %v2973_v58 }
 0x462   :  { %2987 = vmatprep.subr.msk.bf16.mxu0 %vm3317_vm8, %v2985_v59  ;;  %2978 = vmatpush3.bf16.msk.msra.mxu1 %vm3317_vm8, %v2973_v58 }
 0x463   :  { %2990 = vmatpush3.bf16.msk.msra.mxu0 %vm3317_vm8, %v2985_v59  ;;  %2785 = vmatprep.subr.bf16.mxu1 %v3135_v0 }
 0x464   :  { %2831 = vmatprep.subr.bf16.mxu0 %v3135_v0 }
 0x534   :  { %v2777_v62 = vpop.f32.mrb[8].mxu1 }
 0x535   :  { %v545_v63 = vadd.f32 %v2777_v62, %v3335_v60  ;;  %v539_v1 = vpop.f32.mrb[9].mxu1 }
 0x536   :  { %v540_v2 = vadd.f32 %v539_v1, %v3340_v61 }
 0x537   :  { %v553_v3 = vsel %vm552_vm9, %v545_v63, -inf }
 0x538   :  { %554 = vmax.xlane.f32.xlu1 %v553_v3  ;;  %v549_v4 = vsel %vm548_vm10, %v540_v2, -inf  ;;  %v3050_v3 = vld [vmem:[%s3697_s1 + $0xd0] sm:$0xff]  }
 0x539   :  { %550 = vmax.xlane.f32.xlu0 %v549_v4  ;;  %v1074_v4 = vsel %vm460_vm4, %v3050_v3, 0 }
 0x5c5   :  { %v555_v5 = vpop.xlane.xlu1 %554 }
 0x5c6   :  { %v557_v6 = vsub.f32 %v545_v63, %v555_v5  ;;  %v551_v7 = vpop.xlane.xlu0 %550  ;;  %v3051_v5 = vld [vmem:[%s3697_s1 + $0xd8] sm:$0xff]  }
 0x5c7   :  { %v556_v8 = vsub.f32 %v540_v2, %v551_v7 }
 0x5c8   :  { %v560_v9 = vmul.f32 1.442695, %v557_v6  ;;  %v1077_v6 = vsel %vm460_vm4, %v3051_v5, 0 }
 0x5c9   :  { %v558_v10 = vmul.f32 1.442695, %v556_v8 }
 0x5ca   :  { %3086 = vpow2.f32 %v560_v9  ;;  %v3046_v9 = vld [vmem:[%s3697_s1 + $0xc0] sm:$0xff]  }
 0x5cb   :  { %3088 = vpow2.f32 %v558_v10 }
 0x5d4   :  { %v3087_v11 = vpop.eup %3086 }
 0x5d5   :  { %v3089_v12 = vpop.eup %3088  ;;  %v565_v13 = vsel %vm552_vm9, %v3087_v11, 0.0 }
 0x5d6   :  { %566 = vadd.xlane.f32.xlu1 %v565_v13  ;;  %v562_v14 = vsel %vm548_vm10, %v3089_v12, 0.0 }
 0x5d7   :  { %563 = vadd.xlane.f32.xlu0 %v562_v14  ;;  %v1134_v14 = vsel %vm460_vm4, %v3046_v9, 0 }
 0x663   :  { %v567_v15 = vpop.xlane.xlu1 %566 }
 0x664   :  { %3090 = vrcp.f32 %v567_v15  ;;  %v564_v16 = vpop.xlane.xlu0 %563  ;;  %v3047_v15 = vld [vmem:[%s3697_s1 + $0xc8] sm:$0xff]  }
 0x665   :  { %3092 = vrcp.f32 %v564_v16  ;;  %v1137_v16 = vsel %vm460_vm4, %v3047_v15, 0 }
 0x66e   :  { %v3091_v17 = vpop.eup %3090 }
 0x66f   :  { %v3093_v18 = vpop.eup %3092  ;;  %v571_v21 = vmul.f32 %v3091_v17, %v3087_v11  ;;  %v3048_v17 = vld [vmem:[%s3697_s1 + $0x60] sm:$0xff]  }
 0x670   :  { %v569_v19 = vmul.f32 %v3093_v18, %v3089_v12  ;;  %v3049_v18 = vld [vmem:[%s3697_s1 + $0x68] sm:$0xff]  }
 0x672   :  { %2782 = vmatprep.mubr.msk.f32.mxu1 %vm548_vm10, %v569_v19 }
 0x673   :  { %2783 = vmatmul.mubr.msk.f32.vlgmr.msra.gmra.mrb[10].mxu1 %vm548_vm10, %v571_v21  ;;  %v3052_v21 = vld [vmem:[%s3697_s1 + $0x20] sm:$0xff]  }
 0x674   :  { %2786 = vmatpush3.bf16.msra.mxu1 %v3042_v20  ;;  %2789 = vmatprep.mubr.msk.bf16.mxu1 %vm3136_vm3, %v3135_v0 }
 0x675   :  { %2787 = vmatprep.subr.bf16.mxu1 %v3135_v0 }
 0x678   :  { %2788 = vmatpush3.bf16.msra.mxu1 %v3043_v23 }
 0x679   :  { %2793 = vmatprep.subr.bf16.mxu1 %v3135_v0 }
 0x67b   :  { %2790 = vmatmul.mubr.msk.bf16.vlgmr.msra.gmra.mrb[12].mxu1 %vm177_vm1, %v3272_v22 }
 0x67c   :  { %2794 = vmatpush3.bf16.msra.mxu1 %v3044_v24  ;;  %2797 = vmatprep.mubr.msk.bf16.mxu1 %vm3136_vm3, %v3135_v0  ;;  %v3053_v24 = vld [vmem:[%s3697_s1 + $0x28] sm:$0xff]  }
 0x67d   :  { %2795 = vmatprep.subr.bf16.mxu1 %v3135_v0 }
 0x680   :  { %2796 = vmatpush3.bf16.msra.mxu1 %v3045_v25  ;;  %v3054_v25 = vld [vmem:[%s3697_s1 + $0xa0] sm:$0xff]  }
 0x683   :  { %2798 = vmatmul.mubr.msk.bf16.vlgmr.msra.gmra.mrb[16].mxu1 %vm177_vm1, %v3272_v22 }
 0x746   :  { %v3373_v26 = vpop.f32.mrb[10].mxu1 }
 0x747   :  { %v3375_v27 = vpop.f32.mrb[11].mxu1 }
 0x748   :  { %v657_v28 = vpack.c.bf16 %v3373_v26, %v3375_v27  ;;  %v3055_v26 = vld [vmem:[%s3697_s1 + $0xa8] sm:$0xff]  }
 0x74e   :  { %v722_v30 = vpop.f32.mrb[12].mxu1 }
 0x74f   :  { %v723_v31 = vadd.f32 %v2508_v29, %v722_v30  ;;  %v2791_v32 = vpop.f32.mrb[13].mxu1 }
 0x750   :  { %v725_v33 = vpop.f32.mrb[14].mxu1 }
 0x751   :  { %v2792_v34 = vpop.f32.mrb[15].mxu1  ;;  %2813 = vmatprep.mubr.msk.f32.mxu1 %vm460_vm4, %v723_v31  ;;  %v726_v44 = vadd.f32 %v2508_v29, %v725_v33  ;;  %v2561_v31 = vld [vmem:[%s3698_s2 + $0x6] ss:$0 sm:$0xff] }
 0x756   :  { %v788_v36 = vpop.f32.mrb[16].mxu1 }
 0x757   :  { %v2799_v37 = vpop.f32.mrb[17].mxu1  ;;  %v789_v40 = vadd.f32 %v2517_v35, %v788_v36 }
 0x758   :  { %v791_v39 = vpop.f32.mrb[18].mxu1 }
 0x759   :  { %v792_v41 = vadd.f32 %v2517_v35, %v791_v39  ;;  %v2800_v42 = vpop.f32.mrb[19].mxu1 }
 0x75b   :  { %v2979_v43 = vpack.c.bf16 %v792_v41, %v789_v40 }
 0x75d   :  { %2981 = vmatprep.subr.msk.bf16.mxu1 %vm3303_vm5, %v2979_v43 }
 0x75e   :  { %2984 = vmatpush3.bf16.xpose.msk.msra.mxu1 %vm3303_vm5, %v2979_v43 }
 0x75f   :  { %2823 = vmatprep.subr.bf16.mxu1 %v3135_v0 }
 0x765   :  { %2814 = vmatmul.mubr.msk.f32.vlgmr.msra.gmra.mrb[20].mxu1 %vm460_vm4, %v726_v44 }
 0x766   :  { %2827 = vmatprep.mubr.msk.bf16.mxu1 %vm3136_vm3, %v3135_v0  ;;  %2824 = vmatpush3.bf16.xpose.msra.mxu1 %v1074_v4 }
 0x767   :  { %2825 = vmatprep.subr.bf16.mxu1 %v3135_v0 }
 0x76e   :  { %2826 = vmatpush3.bf16.xpose.msra.mxu1 %v1077_v6 }
 0x76f   :  { %2839 = vmatprep.subr.bf16.mxu1 %v3135_v0 }
 0x838   :  { %v2815_v45 = vpop.f32.mrb[20].mxu1 }
 0x839   :  { %v945_v46 = vadd.f32 %v2815_v45, %v3335_v60  ;;  %v939_v48 = vpop.f32.mrb[21].mxu1 }
 0x83a   :  { %v940_v49 = vadd.f32 %v939_v48, %v3340_v61 }
 0x83b   :  { %v951_v50 = vsel %vm552_vm9, %v945_v46, -inf }
 0x83c   :  { %952 = vmax.xlane.f32.xlu1 %v951_v50  ;;  %v948_v52 = vsel %vm548_vm10, %v940_v49, -inf }
 0x83d   :  { %949 = vmax.xlane.f32.xlu0 %v948_v52 }
 0x8c9   :  { %v953_v53 = vpop.xlane.xlu1 %952 }
 0x8ca   :  { %v955_v54 = vsub.f32 %v945_v46, %v953_v53  ;;  %v950_v55 = vpop.xlane.xlu0 %949  ;;  %v2552_v46 = vld [vmem:[%s3698_s2 + $0x2] ss:$0 sm:$0xff] }
 0x8cb   :  { %v954_v57 = vsub.f32 %v940_v49, %v950_v55  ;;  %v2570_v55 = vld [vmem:[%s3698_s2 + $0xa] ss:$0 sm:$0xff] }
 0x8cc   :  { %v958_v58 = vmul.f32 1.442695, %v955_v54 }
 0x8cd   :  { %v956_v59 = vmul.f32 1.442695, %v954_v57 }
 0x8ce   :  { %3094 = vpow2.f32 %v958_v58 }
 0x8cf   :  { %3096 = vpow2.f32 %v956_v59 }
 0x8d8   :  { %v3095_v62 = vpop.eup %3094 }
 0x8d9   :  { %v3097_v63 = vpop.eup %3096  ;;  %v963_v1 = vsel %vm552_vm9, %v3095_v62, 0.0 }
 0x8da   :  { %964 = vadd.xlane.f32.xlu1 %v963_v1  ;;  %v960_v2 = vsel %vm548_vm10, %v3097_v63, 0.0 }
 0x8db   :  { %961 = vadd.xlane.f32.xlu0 %v960_v2 }
 0x967   :  { %v965_v7 = vpop.xlane.xlu1 %964 }
 0x968   :  { %3098 = vrcp.f32 %v965_v7  ;;  %v962_v8 = vpop.xlane.xlu0 %961 }
 0x969   :  { %3100 = vrcp.f32 %v962_v8 }
 0x972   :  { %v3099_v10 = vpop.eup %3098 }
 0x973   :  { %v3101_v11 = vpop.eup %3100  ;;  %v969_v13 = vmul.f32 %v3099_v10, %v3095_v62 }
 0x974   :  { %v967_v12 = vmul.f32 %v3101_v11, %v3097_v63 }
 0x976   :  { %2820 = vmatprep.mubr.msk.f32.mxu0 %vm548_vm10, %v967_v12 }
 0x977   :  { %2821 = vmatmul.mubr.msk.f32.vlgmr.msra.gmra.mrb[12].mxu0 %vm548_vm10, %v969_v13 }
 0x978   :  { %2832 = vmatpush3.bf16.xpose.msra.mxu0 %v1134_v14  ;;  %2835 = vmatprep.mubr.msk.bf16.mxu0 %vm3136_vm3, %v3135_v0 }
 0x979   :  { %2833 = vmatprep.subr.bf16.mxu0 %v3135_v0 }
 0x980   :  { %2834 = vmatpush3.bf16.xpose.msra.mxu0 %v1137_v16 }
 0x981   :  { %2847 = vmatprep.subr.bf16.mxu0 %v3135_v0 }
 0x987   :  { %2836 = vmatmul.mubr.msk.bf16.vlgmr.msra.gmra.mrb[16].mxu0 %vm460_vm4, %v657_v28 }
 0x988   :  { %2848 = vmatpush3.bf16.msra.mxu0 %v3048_v17  ;;  %2851 = vmatprep.mubr.msk.bf16.mxu0 %vm3136_vm3, %v3135_v0 }
 0x989   :  { %2849 = vmatprep.subr.bf16.mxu0 %v3135_v0 }
 0x98c   :  { %2850 = vmatpush3.bf16.msra.mxu0 %v3049_v18 }
 0x98f   :  { %2852 = vmatmul.mubr.msk.bf16.vlgmr.msra.gmra.mrb[20].mxu0 %vm177_vm1, %v3272_v22 }
 0xa4a   :  { %v2822_v19 = vpop.f32.mrb[12].mxu0 }
 0xa4b   :  { %v1045_v20 = vpop.f32.mrb[13].mxu0 }
 0xa4c   :  { %v1054_v23 = vpack.c.bf16 %v2822_v19, %v1045_v20  ;;  %v3060_v19 = vld [vmem:[%s3697_s1 + $0xe0] sm:$0xff]  }
 0xa4d   :  { %v1591_v20 = vsel %vm460_vm4, %v3060_v19, 0 }
 0xa4e   :  { %2828 = vmatmul.mubr.msk.bf16.vlgmr.msra.gmra.mrb[24].mxu1 %vm460_vm4, %v1054_v23 }
 0xa4f   :  { %2840 = vmatpush3.bf16.msra.mxu1 %v3052_v21  ;;  %2843 = vmatprep.mubr.msk.bf16.mxu1 %vm3136_vm3, %v3135_v0  ;;  %v3061_v21 = vld [vmem:[%s3697_s1 + $0xe8] sm:$0xff]  }
 0xa50   :  { %2841 = vmatprep.subr.bf16.mxu1 %v3135_v0  ;;  %v1594_v23 = vsel %vm460_vm4, %v3061_v21, 0 }
 0xa53   :  { %2842 = vmatpush3.bf16.msra.mxu1 %v3053_v24 }
 0xa54   :  { %2855 = vmatprep.subr.bf16.mxu1 %v3135_v0 }
 0xa56   :  { %2844 = vmatmul.mubr.msk.bf16.vlgmr.msra.gmra.mrb[28].mxu1 %vm177_vm1, %v3272_v22 }
 0xa57   :  { %2856 = vmatpush3.bf16.msra.mxu1 %v3054_v25  ;;  %2859 = vmatprep.mubr.msk.bf16.mxu1 %vm3136_vm3, %v3135_v0 }
 0xa58   :  { %2857 = vmatprep.subr.bf16.mxu1 %v3135_v0 }
 0xa5a   :  { %v1173_v27 = vpop.f32.mrb[16].mxu0 }
 0xa5b   :  { %v2837_v28 = vpop.f32.mrb[17].mxu0  ;;  %2858 = vmatpush3.bf16.msra.mxu1 %v3055_v26 }
 0xa5c   :  { %v1176_v29 = vpop.f32.mrb[18].mxu0  ;;  %2877 = vmatprep.subr.bf16.mxu1 %v3135_v0 }
 0xa5d   :  { %v2838_v30 = vpop.f32.mrb[19].mxu0 }
 0xa5e   :  { %2860 = vmatmul.mubr.msk.bf16.vlgmr.msra.gmra.mrb[32].mxu1 %vm177_vm1, %v3272_v22 }
 0xa5f   :  { %2881 = vmatprep.mubr.msk.bf16.mxu1 %vm3136_vm3, %v3135_v0 }
 0xa62   :  { %v1305_v32 = vpop.f32.mrb[20].mxu0 }
 0xa63   :  { %v2853_v33 = vpop.f32.mrb[21].mxu0  ;;  %v1306_v35 = vadd.f32 %v2561_v31, %v1305_v32  ;;  %v3058_v32 = vld [vmem:[%s3697_s1 + $0x70] sm:$0xff]  }
 0xa64   :  { %v1308_v34 = vpop.f32.mrb[22].mxu0  ;;  %2878 = vmatpush3.bf16.xpose.msra.mxu1 %v1591_v20  ;;  %v3059_v33 = vld [vmem:[%s3697_s1 + $0x78] sm:$0xff]  }
 0xa65   :  { %v1309_v36 = vadd.f32 %v2561_v31, %v1308_v34  ;;  %v2854_v37 = vpop.f32.mrb[23].mxu0  ;;  %2879 = vmatprep.subr.bf16.mxu1 %v3135_v0  ;;  %v3057_v31 = vld [vmem:[%s3697_s1 + $0x38] sm:$0xff]  }
 0xa67   :  { %v2991_v39 = vpack.c.bf16 %v1309_v36, %v1306_v35  ;;  %v3062_v36 = vld [vmem:[%s3697_s1 + $0xb0] sm:$0xff]  }
 0xa69   :  { %2993 = vmatprep.subr.msk.bf16.mxu0 %vm3303_vm5, %v2991_v39 }
 0xa6a   :  { %2996 = vmatpush3.bf16.xpose.msk.msra.mxu0 %vm3303_vm5, %v2991_v39  ;;  %v3063_v39 = vld [vmem:[%s3697_s1 + $0xb8] sm:$0xff]  }
 0xa6c   :  { %2880 = vmatpush3.bf16.xpose.msra.mxu1 %v1594_v23  ;;  %v3064_v23 = vld [vmem:[%s3697_s1 + $0xf0] sm:$0xff]  }
 0xa6d   :  { %2901 = vmatprep.subr.bf16.mxu1 %v3135_v0 }
 0xb21   :  { %v1113_v40 = vpop.f32.mrb[24].mxu1 }
 0xb22   :  { %v3473_v41 = vadd.f32 %v1173_v27, %v1113_v40  ;;  %v2829_v42 = vpop.f32.mrb[25].mxu1  ;;  %v2593_v40 = vld [vmem:[%s3698_s2 + $0x3] ss:$0 sm:$0xff] }
 0xb23   :  { %v1116_v43 = vpop.f32.mrb[26].mxu1 }
 0xb24   :  { %v3475_v44 = vadd.f32 %v1176_v29, %v1116_v43  ;;  %v2830_v45 = vpop.f32.mrb[27].mxu1  ;;  %v3056_v29 = vld [vmem:[%s3697_s1 + $0x30] sm:$0xff]  }
 0xb29   :  { %v1239_v48 = vpop.f32.mrb[28].mxu1 }
 0xb2a   :  { %v1240_v49 = vadd.f32 %v2552_v46, %v1239_v48  ;;  %v2845_v50 = vpop.f32.mrb[29].mxu1 }
 0xb2b   :  { %v1242_v52 = vpop.f32.mrb[30].mxu1 }
 0xb2c   :  { %v1243_v53 = vadd.f32 %v2552_v46, %v1242_v52  ;;  %v2846_v54 = vpop.f32.mrb[31].mxu1  ;;  %2867 = vmatprep.mubr.msk.f32.mxu0 %vm460_vm4, %v1240_v49  ;;  %v2602_v49 = vld [vmem:[%s3698_s2 + $0x7] ss:$0 sm:$0xff] }
 0xb2e   :  { %2868 = vmatmul.mubr.msk.f32.vlgmr.msra.gmra.mrb[14].mxu0 %vm460_vm4, %v1243_v53 }
 0xb31   :  { %v1371_v57 = vpop.f32.mrb[32].mxu1 }
 0xb32   :  { %v2861_v58 = vpop.f32.mrb[33].mxu1  ;;  %v1372_v62 = vadd.f32 %v2570_v55, %v1371_v57 }
 0xb33   :  { %v1374_v59 = vpop.f32.mrb[34].mxu1 }
 0xb34   :  { %v1375_v63 = vadd.f32 %v2570_v55, %v1374_v59  ;;  %v2862_v1 = vpop.f32.mrb[35].mxu1 }
 0xb36   :  { %v2997_v2 = vpack.c.bf16 %v1375_v63, %v1372_v62 }
 0xb38   :  { %2999 = vmatprep.subr.msk.bf16.mxu0 %vm3317_vm8, %v2997_v2 }
 0xb39   :  { %3002 = vmatpush3.bf16.msk.msra.mxu0 %vm3317_vm8, %v2997_v2 }
 0xb3a   :  { %2885 = vmatprep.subr.bf16.mxu0 %v3135_v0 }
 0xc01   :  { %v2869_v3 = vpop.f32.mrb[14].mxu0 }
 0xc02   :  { %v1462_v4 = vadd.f32 %v2869_v3, %v3335_v60  ;;  %v1456_v5 = vpop.f32.mrb[15].mxu0 }
 0xc03   :  { %v1457_v6 = vadd.f32 %v1456_v5, %v3340_v61 }
 0xc04   :  { %v1468_v7 = vsel %vm552_vm9, %v1462_v4, -inf }
 0xc05   :  { %1469 = vmax.xlane.f32.xlu1 %v1468_v7  ;;  %v1465_v8 = vsel %vm548_vm10, %v1457_v6, -inf }
 0xc06   :  { %1466 = vmax.xlane.f32.xlu0 %v1465_v8 }
 0xc92   :  { %v1470_v9 = vpop.xlane.xlu1 %1469 }
 0xc93   :  { %v1472_v10 = vsub.f32 %v1462_v4, %v1470_v9  ;;  %v1467_v11 = vpop.xlane.xlu0 %1466 }
 0xc94   :  { %v1471_v12 = vsub.f32 %v1457_v6, %v1467_v11 }
 0xc95   :  { %v1475_v13 = vmul.f32 1.442695, %v1472_v10 }
 0xc96   :  { %v1473_v14 = vmul.f32 1.442695, %v1471_v12 }
 0xc97   :  { %3102 = vpow2.f32 %v1475_v13 }
 0xc98   :  { %3104 = vpow2.f32 %v1473_v14 }
 0xca1   :  { %v3103_v15 = vpop.eup %3102 }
 0xca2   :  { %v3105_v16 = vpop.eup %3104  ;;  %v1480_v17 = vsel %vm552_vm9, %v3103_v15, 0.0 }
 0xca3   :  { %1481 = vadd.xlane.f32.xlu1 %v1480_v17  ;;  %v1477_v18 = vsel %vm548_vm10, %v3105_v16, 0.0 }
 0xca4   :  { %1478 = vadd.xlane.f32.xlu0 %v1477_v18 }
 0xd30   :  { %v1482_v24 = vpop.xlane.xlu1 %1481 }
 0xd31   :  { %3106 = vrcp.f32 %v1482_v24  ;;  %v1479_v25 = vpop.xlane.xlu0 %1478  ;;  %v2050_v24 = vsel %vm460_vm4, %v3064_v23, 0  ;;  %v2632_v23 = vld [vmem:[%s3696_s4 + $0x7] ss:$0 sm:$0xff] }
 0xd32   :  { %3108 = vrcp.f32 %v1479_v25  ;;  %v3065_v25 = vld [vmem:[%s3697_s1 + $0xf8] sm:$0xff]  }
 0xd3b   :  { %v3107_v26 = vpop.eup %3106 }
 0xd3c   :  { %v3109_v27 = vpop.eup %3108  ;;  %v1486_v30 = vmul.f32 %v3107_v26, %v3103_v15  ;;  %v2053_v26 = vsel %vm460_vm4, %v3065_v25, 0 }
 0xd3d   :  { %v1484_v28 = vmul.f32 %v3109_v27, %v3105_v16 }
 0xd3f   :  { %2874 = vmatprep.mubr.msk.f32.mxu0 %vm548_vm10, %v1484_v28 }
 0xd40   :  { %2875 = vmatmul.mubr.msk.f32.vlgmr.msra.gmra.mrb[24].mxu0 %vm548_vm10, %v1486_v30 }
 0xd41   :  { %2886 = vmatpush3.bf16.msra.mxu0 %v3056_v29  ;;  %2889 = vmatprep.mubr.msk.bf16.mxu0 %vm3136_vm3, %v3135_v0 }
 0xd42   :  { %2887 = vmatprep.subr.bf16.mxu0 %v3135_v0 }
 0xd45   :  { %2888 = vmatpush3.bf16.msra.mxu0 %v3057_v31 }
 0xd46   :  { %2893 = vmatprep.subr.bf16.mxu0 %v3135_v0 }
 0xd48   :  { %2890 = vmatmul.mubr.msk.bf16.vlgmr.msra.gmra.mrb[28].mxu0 %vm177_vm1, %v3272_v22 }
 0xd49   :  { %2894 = vmatpush3.bf16.msra.mxu0 %v3058_v32  ;;  %2897 = vmatprep.mubr.msk.bf16.mxu0 %vm3136_vm3, %v3135_v0 }
 0xd4a   :  { %2895 = vmatprep.subr.bf16.mxu0 %v3135_v0 }
 0xd4d   :  { %2896 = vmatpush3.bf16.msra.mxu0 %v3059_v33 }
 0xd50   :  { %2898 = vmatmul.mubr.msk.bf16.vlgmr.msra.gmra.mrb[32].mxu0 %vm177_vm1, %v3272_v22 }
 0xe13   :  { %v2876_v34 = vpop.f32.mrb[24].mxu0 }
 0xe14   :  { %v1562_v35 = vpop.f32.mrb[25].mxu0 }
 0xe15   :  { %v1571_v37 = vpack.c.bf16 %v2876_v34, %v1562_v35 }
 0xe17   :  { %2882 = vmatmul.mubr.msk.bf16.vlgmr.msra.gmra.mrb[36].mxu1 %vm460_vm4, %v1571_v37 }
 0xe18   :  { %2902 = vmatpush3.bf16.msra.mxu1 %v3062_v36  ;;  %2905 = vmatprep.mubr.msk.bf16.mxu1 %vm3136_vm3, %v3135_v0 }
 0xe19   :  { %2903 = vmatprep.subr.bf16.mxu1 %v3135_v0 }
 0xe1b   :  { %v1698_v42 = vpop.f32.mrb[28].mxu0 }
 0xe1c   :  { %v1699_v43 = vadd.f32 %v2593_v40, %v1698_v42  ;;  %v2891_v45 = vpop.f32.mrb[29].mxu0  ;;  %2904 = vmatpush3.bf16.msra.mxu1 %v3063_v39 }
 0xe1d   :  { %v1701_v46 = vpop.f32.mrb[30].mxu0 }
 0xe1e   :  { %v2892_v48 = vpop.f32.mrb[31].mxu0  ;;  %2913 = vmatprep.mubr.msk.f32.mxu0 %vm460_vm4, %v1699_v43 }
 0xe1f   :  { %2906 = vmatmul.mubr.msk.bf16.vlgmr.msra.gmra.mrb[40].mxu1 %vm177_vm1, %v3272_v22  ;;  %v1702_v22 = vadd.f32 %v2593_v40, %v1701_v46  ;;  %v2629_v40 = vld [vmem:[%s3696_s4 + $0x4] ss:$0 sm:$0xff] }
 0xe23   :  { %v1764_v50 = vpop.f32.mrb[32].mxu0 }
 0xe24   :  { %v2899_v52 = vpop.f32.mrb[33].mxu0  ;;  %v1765_v54 = vadd.f32 %v2602_v49, %v1764_v50 }
 0xe25   :  { %v1767_v53 = vpop.f32.mrb[34].mxu0 }
 0xe26   :  { %v1768_v55 = vadd.f32 %v2602_v49, %v1767_v53  ;;  %v2900_v57 = vpop.f32.mrb[35].mxu0 }
 0xe28   :  { %v3003_v58 = vpack.c.bf16 %v1768_v55, %v1765_v54 }
 0xe2a   :  { %3005 = vmatprep.subr.msk.bf16.mxu0 %vm3303_vm5, %v3003_v58 }
 0xe2b   :  { %3008 = vmatpush3.bf16.xpose.msk.msra.mxu0 %vm3303_vm5, %v3003_v58 }
 0xe2c   :  { %2923 = vmatprep.subr.bf16.mxu0 %v3135_v0 }
 0xe32   :  { %2914 = vmatmul.mubr.msk.f32.vlgmr.msra.gmra.mrb[26].mxu0 %vm460_vm4, %v1702_v22 }
 0xe33   :  { %2927 = vmatprep.mubr.msk.bf16.mxu0 %vm3136_vm3, %v3135_v0  ;;  %2924 = vmatpush3.bf16.xpose.msra.mxu0 %v2050_v24 }
 0xe34   :  { %2925 = vmatprep.subr.bf16.mxu0 %v3135_v0 }
 0xe3b   :  { %2926 = vmatpush3.bf16.xpose.msra.mxu0 %v2053_v26 }
 0xe3c   :  { %2959 = vmatprep.subr.bf16.mxu0 %v3135_v0 }
 0xeea   :  { %v1630_v59 = vpop.f32.mrb[36].mxu1 }
 0xeeb   :  { %v3559_v62 = vadd.f32 %v1630_v59, %v3473_v41  ;;  %v2883_v63 = vpop.f32.mrb[37].mxu1 }
 0xeec   :  { %v1633_v1 = vpop.f32.mrb[38].mxu1 }
 0xeed   :  { %v3562_v2 = vadd.f32 %v1633_v1, %v3475_v44  ;;  %v2884_v3 = vpop.f32.mrb[39].mxu1  ;;  %v3066_v1 = vld [vmem:[%s3694_s3 + $0x60] sm:$0xff]  }
 0xef2   :  { %v1830_v4 = vpop.f32.mrb[40].mxu1 }
 0xef3   :  { %v2907_v5 = vpop.f32.mrb[41].mxu1  ;;  %v1831_v7 = vadd.f32 %v2611_v38, %v1830_v4 }
 0xef4   :  { %v1833_v6 = vpop.f32.mrb[42].mxu1 }
 0xef5   :  { %v1834_v8 = vadd.f32 %v2611_v38, %v1833_v6  ;;  %v2908_v9 = vpop.f32.mrb[43].mxu1 }
 0xef6   :  { %v2630_v9 = vld [vmem:[%s3696_s4 + $0x5] ss:$0 sm:$0xff] }
 0xef7   :  { %v3009_v10 = vpack.c.bf16 %v1834_v8, %v1831_v7 }
 0xef9   :  { %3011 = vmatprep.subr.msk.bf16.mxu1 %vm3317_vm8, %v3009_v10 }
 0xefa   :  { %3014 = vmatpush3.bf16.msk.msra.mxu1 %vm3317_vm8, %v3009_v10 }
 0xefb   :  { %2931 = vmatprep.subr.bf16.mxu1 %v3135_v0 }
 0xf05   :  { %v2915_v41 = vpop.f32.mrb[26].mxu0 }
 0xf06   :  { %v1921_v44 = vadd.f32 %v2915_v41, %v3335_v60  ;;  %v1915_v11 = vpop.f32.mrb[27].mxu0 }
 0xf07   :  { %v1916_v12 = vadd.f32 %v1915_v11, %v3340_v61 }
 0xf08   :  { %v1927_v13 = vsel %vm552_vm9, %v1921_v44, -inf }
 0xf09   :  { %1928 = vmax.xlane.f32.xlu1 %v1927_v13  ;;  %v1924_v14 = vsel %vm548_vm10, %v1916_v12, -inf }
 0xf0a   :  { %1925 = vmax.xlane.f32.xlu0 %v1924_v14 }
 0xf96   :  { %v1929_v15 = vpop.xlane.xlu1 %1928 }
 0xf97   :  { %v1931_v16 = vsub.f32 %v1921_v44, %v1929_v15  ;;  %v1926_v17 = vpop.xlane.xlu0 %1925 }
 0xf98   :  { %v1930_v18 = vsub.f32 %v1916_v12, %v1926_v17  ;;  %v2631_v12 = vld [vmem:[%s3696_s4 + $0x6] ss:$0 sm:$0xff]  ;;  %v3068_v17 = vld [vmem:[%s3694_s3 + $0x70] sm:$0xff]  }
 0xf99   :  { %v1934_v56 = vmul.f32 1.442695, %v1931_v16 }
 0xf9a   :  { %v1932_v19 = vmul.f32 1.442695, %v1930_v18  ;;  %v3069_v18 = vld [vmem:[%s3694_s3 + $0x78] sm:$0xff]  }
 0xf9b   :  { %3110 = vpow2.f32 %v1934_v56  ;;  %v3070_v56 = vld [vmem:[%s3694_s3 + $0x80] sm:$0xff]  }
 0xf9c   :  { %3112 = vpow2.f32 %v1932_v19  ;;  %v3071_v19 = vld [vmem:[%s3694_s3 + $0x88] sm:$0xff]  }
 0xfa5   :  { %v3111_v20 = vpop.eup %3110 }
 0xfa6   :  { %v3113_v21 = vpop.eup %3112  ;;  %v1939_v60 = vsel %vm552_vm9, %v3111_v20, 0.0 }
 0xfa7   :  { %1940 = vadd.xlane.f32.xlu1 %v1939_v60  ;;  %v1936_v61 = vsel %vm548_vm10, %v3113_v21, 0.0  ;;  %v3074_v60 = vld [vmem:[%s3694_s3 + $0xa0] sm:$0xff]  }
 0xfa8   :  { %1937 = vadd.xlane.f32.xlu0 %v1936_v61  ;;  %v3075_v61 = vld [vmem:[%s3694_s3 + $0xa8] sm:$0xff]  }
0x1034   :  { %v1941_v27 = vpop.xlane.xlu1 %1940 }
0x1035   :  { %3114 = vrcp.f32 %v1941_v27  ;;  %v1938_v28 = vpop.xlane.xlu0 %1937 }
0x1036   :  { %3116 = vrcp.f32 %v1938_v28 }
0x103f   :  { %v3115_v29 = vpop.eup %3114 }
0x1040   :  { %v3117_v30 = vpop.eup %3116  ;;  %v1945_v32 = vmul.f32 %v3115_v29, %v3111_v20  ;;  %v3072_v20 = vld [vmem:[%s3694_s3 + $0x90] sm:$0xff]  }
0x1041   :  { %v1943_v31 = vmul.f32 %v3117_v30, %v3113_v21  ;;  %v3073_v21 = vld [vmem:[%s3694_s3 + $0x98] sm:$0xff]  }
0x1043   :  { %2920 = vmatprep.mubr.msk.f32.mxu1 %vm548_vm10, %v1943_v31 }
0x1044   :  { %2921 = vmatmul.mubr.msk.f32.vlgmr.msra.gmra.mrb[22].mxu1 %vm548_vm10, %v1945_v32 }
0x1045   :  { %2935 = vmatprep.mubr.msk.bf16.mxu1 %vm3136_vm3, %v3135_v0  ;;  %2932 = vmatpush3.bf16.msra.mxu1 %v3066_v1 }
0x1046   :  { %2933 = vmatprep.subr.bf16.mxu1 %v3135_v0 }
0x1117   :  { %v2922_v33 = vpop.f32.mrb[22].mxu1 }
0x1118   :  { %v2021_v34 = vpop.f32.mrb[23].mxu1 }
0x1119   :  { %v2030_v35 = vpack.c.bf16 %v2922_v33, %v2021_v34 }
0x111b   :  { %2928 = vmatmul.mubr.msk.bf16.vlgmr.msra.gmra.mrb[36].mxu0 %vm460_vm4, %v2030_v35 }
0x111c   :  { %2963 = vmatprep.mubr.msk.bf16.mxu0 %vm3136_vm3, %v3135_v0 }
0x11ee   :  { %v2089_v36 = vpop.f32.mrb[36].mxu0 }
0x11ef   :  { %v2096_v37 = vadd.f32 %v2089_v36, %v3559_v62  ;;  %v2929_v39 = vpop.f32.mrb[37].mxu0 }
0x11f0   :  { %v2092_v42 = vpop.f32.mrb[38].mxu0 }
0x11f1   :  { %v2098_v43 = vadd.f32 %v2096_v37, %v3226_v47  ;;  %v2097_v45 = vadd.f32 %v2092_v42, %v3562_v2  ;;  %v2930_v46 = vpop.f32.mrb[39].mxu0  ;;  %v3067_v2 = vld [vmem:[%s3694_s3 + $0x68] sm:$0xff]  }
0x11f2   :  { %2934 = vmatpush3.bf16.msra.mxu1 %v3067_v2  ;;  %v2638_v46 = vld [vmem:[%s3696_s4 + $0x8] ss:$0 sm:$0xff] }
0x11f3   :  { %v3601_v48 = vadd.f32 %v2629_v40, %v2098_v43  ;;  %v2099_v49 = vadd.f32 %v2097_v45, %v3230_v51  ;;  %2939 = vmatprep.subr.bf16.mxu1 %v3135_v0 }
0x11f5   :  { %v3604_v50 = vadd.f32 %v2629_v40, %v2099_v49  ;;  %v2109_v52 = vsel %vm177_vm1, %v3601_v48, 0.0 }
0x11f6   :  { %2110 = vadd.xlane.f32.xlu0 %v2109_v52 }
0x11f7   :  { %v2112_v53 = vsel %vm181_vm2, %v3604_v50, 0.0 }
0x11f8   :  { %2113 = vadd.xlane.f32.xlu1 %v2112_v53 }
0x1283   :  { %v2111_v54 = vpop.xlane.xlu0 %2110 }
0x1284   :  { %v2115_v55 = vmul.f32 0.03125, %v2111_v54 }
0x1285   :  { %v2114_v47 = vpop.xlane.xlu1 %2113 }
0x1286   :  { %v2117_v57 = vsub.f32 %v3601_v48, %v2115_v55  ;;  %v2116_v58 = vmul.f32 0.03125, %v2114_v47 }
0x1288   :  { %v2118_v22 = vsub.f32 %v3604_v50, %v2116_v58  ;;  %v2119_v59 = vmul.f32 %v2117_v57, %v2117_v57 }
0x128a   :  { %v2121_v51 = vsel %vm177_vm1, %v2119_v59, 0.0  ;;  %v2120_v62 = vmul.f32 %v2118_v22, %v2118_v22 }
0x128b   :  { %2122 = vadd.xlane.f32.xlu0 %v2121_v51 }
0x128c   :  { %v2124_v63 = vsel %vm181_vm2, %v2120_v62, 0.0 }
0x128d   :  { %2125 = vadd.xlane.f32.xlu1 %v2124_v63 }
0x1318   :  { %v2123_v3 = vpop.xlane.xlu0 %2122 }
0x1319   :  { %v2127_v38 = vmul.f32 0.03125, %v2123_v3 }
0x131a   :  { %v2126_v4 = vpop.xlane.xlu1 %2125 }
0x131b   :  { %v2129_v5 = vadd.f32 1e-05, %v2127_v38  ;;  %v2128_v6 = vmul.f32 0.03125, %v2126_v4 }
0x131d   :  { %3118 = vrsqrt.f32 %v2129_v5  ;;  %v2130_v7 = vadd.f32 1e-05, %v2128_v6  ;;  %v3077_v6 = vld [vmem:[%s3694_s3 + $0xb8] sm:$0xff]  }
0x131f   :  { %3120 = vrsqrt.f32 %v2130_v7 }
0x1327   :  { %v3119_v8 = vpop.eup %3118 }
0x1328   :  { %v2133_v10 = vmul.f32 %v3119_v8, %v2117_v57 }
0x1329   :  { %v3121_v41 = vpop.eup %3120 }
0x132a   :  { %v2139_v44 = vmul.f32 %v2630_v9, %v2133_v10  ;;  %v2134_v11 = vmul.f32 %v3121_v41, %v2118_v22 }
0x132c   :  { %v2140_v13 = vmul.f32 %v2630_v9, %v2134_v11  ;;  %v2145_v14 = vadd.f32 %v2631_v12, %v2139_v44 }
0x132e   :  { %v2146_v15 = vadd.f32 %v2631_v12, %v2140_v13  ;;  %v2647_v12 = vld [vmem:[%s3696_s4 + $0x9] ss:$0 sm:$0xff] }
0x1330   :  { %v2147_v16 = vpack.c.bf16 %v2146_v15, %v2145_v14 }
0x1332   :  { %2936 = vmatmul.mubr.msk.bf16.vlgmr.msra.gmra.mrb[44].mxu1 %vm177_vm1, %v2147_v16  ;;  %v2648_v16 = vld [vmem:[%s3696_s4 + $0xa] ss:$0 sm:$0xff] }
0x1333   :  { %2955 = vmatprep.mubr.msk.bf16.mxu1 %vm3136_vm3, %v3135_v0  ;;  %2940 = vmatpush3.bf16.msra.mxu1 %v3068_v17 }
0x1334   :  { %2941 = vmatprep.subr.bf16.mxu1 %v3135_v0 }
0x1337   :  { %2942 = vmatpush3.bf16.msra.mxu1 %v3069_v18 }
0x1338   :  { %2943 = vmatprep.subr.bf16.mxu1 %v3135_v0 }
0x133b   :  { %2944 = vmatpush3.bf16.msra.mxu1 %v3070_v56 }
0x133c   :  { %2945 = vmatprep.subr.bf16.mxu1 %v3135_v0 }
0x133f   :  { %2946 = vmatpush3.bf16.msra.mxu1 %v3071_v19 }
0x1340   :  { %2947 = vmatprep.subr.bf16.mxu1 %v3135_v0 }
0x1343   :  { %2948 = vmatpush3.bf16.msra.mxu1 %v3072_v20 }
0x1344   :  { %2949 = vmatprep.subr.bf16.mxu1 %v3135_v0 }
0x1347   :  { %2950 = vmatpush3.bf16.msra.mxu1 %v3073_v21 }
0x1348   :  { %2951 = vmatprep.subr.bf16.mxu1 %v3135_v0 }
0x134b   :  { %2952 = vmatpush3.bf16.msra.mxu1 %v3074_v60 }
0x134c   :  { %2953 = vmatprep.subr.bf16.mxu1 %v3135_v0 }
0x134f   :  { %2954 = vmatpush3.bf16.msra.mxu1 %v3075_v61 }
0x1405   :  { %v2206_v24 = vpop.f32.mrb[44].mxu1 }
0x1406   :  { %v2207_v25 = vadd.f32 %v2632_v23, %v2206_v24  ;;  %v2937_v26 = vpop.f32.mrb[45].mxu1 }
0x1407   :  { %v2209_v27 = vpop.f32.mrb[46].mxu1 }
0x1408   :  { %v2636_v28 = vmul.f32 -1.702, %v2207_v25  ;;  %v2210_v29 = vadd.f32 %v2632_v23, %v2209_v27  ;;  %v2938_v30 = vpop.f32.mrb[47].mxu1 }
0x140a   :  { %v2217_v31 = vmul.f32 1.442695, %v2636_v28  ;;  %v2637_v32 = vmul.f32 -1.702, %v2210_v29 }
0x140c   :  { %3122 = vpow2.f32 %v2217_v31  ;;  %v2219_v33 = vmul.f32 1.442695, %v2637_v32 }
0x140e   :  { %3124 = vpow2.f32 %v2219_v33 }
0x1416   :  { %v3123_v34 = vpop.eup %3122 }
0x1417   :  { %v2221_v35 = vadd.f32 1.0, %v3123_v34 }
0x1418   :  { %v3125_v36 = vpop.eup %3124 }
0x1419   :  { %3126 = vrcp.f32 %v2221_v35  ;;  %v2222_v37 = vadd.f32 1.0, %v3125_v36 }
0x141b   :  { %3128 = vrcp.f32 %v2222_v37 }
0x1423   :  { %v3127_v39 = vpop.eup %3126 }
0x1424   :  { %v2227_v42 = vmul.f32 %v3127_v39, %v2207_v25 }
0x1425   :  { %v3129_v40 = vpop.eup %3128 }
0x1426   :  { %v2228_v43 = vmul.f32 %v3129_v40, %v2210_v29 }
0x1428   :  { %v2229_v45 = vpack.c.bf16 %v2228_v43, %v2227_v42 }
0x142a   :  { %2956 = vmatmul.mubr.bf16.vlgmr.msra.gmra.mrb[48].mxu1 %v2229_v45 }
0x14fd   :  { %v2333_v49 = vpop.f32.mrb[48].mxu1 }
0x14fe   :  { %v2334_v52 = vadd.f32 %v2638_v46, %v2333_v49  ;;  %v2957_v53 = vpop.f32.mrb[49].mxu1 }
0x14ff   :  { %v2336_v54 = vpop.f32.mrb[50].mxu1 }
0x1500   :  { %v2337_v55 = vadd.f32 %v2638_v46, %v2336_v54  ;;  %v2958_v47 = vpop.f32.mrb[51].mxu1  ;;  %v2340_v57 = vadd.f32 %v2334_v52, %v3601_v48 }
0x1502   :  { %v2344_v58 = vsel %vm177_vm1, %v2340_v57, 0.0  ;;  %v2341_v22 = vadd.f32 %v2337_v55, %v3604_v50  ;;  %v3076_v50 = vld [vmem:[%s3694_s3 + $0xb0] sm:$0xff]  }
0x1503   :  { %2345 = vadd.xlane.f32.xlu0 %v2344_v58  ;;  %2960 = vmatpush3.bf16.msra.mxu0 %v3076_v50 }
0x1504   :  { %v2347_v59 = vsel %vm181_vm2, %v2341_v22, 0.0  ;;  %2961 = vmatprep.subr.bf16.mxu0 %v3135_v0 }
0x1505   :  { %2348 = vadd.xlane.f32.xlu1 %v2347_v59 }
0x1507   :  { %2962 = vmatpush3.bf16.msra.mxu0 %v3077_v6 }
0x1590   :  { %v2346_v51 = vpop.xlane.xlu0 %2345 }
0x1591   :  { %v2350_v62 = vmul.f32 0.03125, %v2346_v51 }
0x1592   :  { %v2349_v63 = vpop.xlane.xlu1 %2348 }
0x1593   :  { %v2352_v1 = vsub.f32 %v2340_v57, %v2350_v62  ;;  %v2351_v2 = vmul.f32 0.03125, %v2349_v63 }
0x1595   :  { %v2353_v3 = vsub.f32 %v2341_v22, %v2351_v2  ;;  %v2354_v38 = vmul.f32 %v2352_v1, %v2352_v1 }
0x1597   :  { %v2356_v4 = vsel %vm177_vm1, %v2354_v38, 0.0  ;;  %v2355_v5 = vmul.f32 %v2353_v3, %v2353_v3 }
0x1598   :  { %2357 = vadd.xlane.f32.xlu0 %v2356_v4 }
0x1599   :  { %v2359_v48 = vsel %vm181_vm2, %v2355_v5, 0.0 }
0x159a   :  { %2360 = vadd.xlane.f32.xlu1 %v2359_v48 }
0x1625   :  { %v2358_v7 = vpop.xlane.xlu0 %2357 }
0x1626   :  { %v2362_v8 = vmul.f32 0.03125, %v2358_v7 }
0x1627   :  { %v2361_v9 = vpop.xlane.xlu1 %2360 }
0x1628   :  { %v2364_v10 = vadd.f32 1e-05, %v2362_v8  ;;  %v2363_v41 = vmul.f32 0.03125, %v2361_v9 }
0x162a   :  { %3130 = vrsqrt.f32 %v2364_v10  ;;  %v2365_v44 = vadd.f32 1e-05, %v2363_v41 }
0x162c   :  { %3132 = vrsqrt.f32 %v2365_v44 }
0x1634   :  { %v3131_v11 = vpop.eup %3130 }
0x1635   :  { %v2368_v13 = vmul.f32 %v3131_v11, %v2352_v1 }
0x1636   :  { %v3133_v0 = vpop.eup %3132 }
0x1637   :  { %v2374_v14 = vmul.f32 %v2647_v12, %v2368_v13  ;;  %v2369_v15 = vmul.f32 %v3133_v0, %v2353_v3 }
0x1639   :  { %v2375_v17 = vmul.f32 %v2647_v12, %v2369_v15  ;;  %v2380_v18 = vadd.f32 %v2648_v16, %v2374_v14 }
0x163b   :  { %v2381_v56 = vadd.f32 %v2648_v16, %v2375_v17 }
0x163d   :  { %v2382_v19 = vpack.c.bf16 %v2381_v56, %v2380_v18 }
0x163f   :  { %2964 = vmatmul.mubr.msk.bf16.vlgmr.msra.gmra.mrb[40].mxu0 %vm177_vm1, %v2382_v19 }
0x1712   :  { %v2436_v20 = vpop.f32.mrb[40].mxu0 }
0x1713   :  { %2444 = vst.msk [vmem:[%s3699_s5] sm:$0xff] %vm2443_vm11, %v2436_v20  ;;  %v2965_v21 = vpop.f32.mrb[41].mxu0 }
0x1714   :  { %v2439_v60 = vpop.f32.mrb[42].mxu0 }
0x1715   :  { %2446 = vst.msk [vmem:[%s3699_s5 + $0x8] sm:$0x3] %vm2445_vm12, %v2439_v60  ;;  %v2966_v61 = vpop.f32.mrb[43].mxu0 }

</bundles_post_ra>
